<compile_context>
chip_gen: v5e
topology: v5e:2x2
jax: 0.10.0
libtpu: 0.0.40
codegen_flags: <defaults>
</compile_context>

<pallas_src>
import functools

import jax
import jax.numpy as jnp
from jax.experimental import pallas as pl
from jax.experimental.pallas import tpu as pltpu


def self_attention_kernel(x_ref, wqkv_ref, wu_ref, bu_ref, o_ref,
                          *, heads, dim_head):
    """One grid step = `BB` batch elements. All matmuls + softmax done in-kernel."""
    BB, N, D = x_ref.shape
    HD = heads * dim_head

    # bf16 MXU operands, f32 accumulation.
    x = x_ref[...].reshape(BB * N, D).astype(jnp.bfloat16)          # (BB*N, D)

    # Fused QKV projection: one (BB*N, D) @ (D, 3*HD) MXU pass.
    # W_q was pre-scaled by dim_head**-0.5 in the wrapper.
    qkv = jnp.dot(x, wqkv_ref[...],
                  preferred_element_type=jnp.float32)               # (BB*N, 3*HD) f32
    qkv = qkv.reshape(BB, N, 3 * HD).astype(jnp.bfloat16)           # bf16 MXU operands

    wu = wu_ref[...]                                                 # (HD, D) bf16
    bu = bu_ref[...]                                                 # (1, D)  f32

    # Per-head attention; accumulate the unify_heads projection directly so no
    # in-kernel concatenate / lane relayout is needed.
    acc = jnp.zeros((BB * N, D), dtype=jnp.float32)
    for h in range(heads):
        lo = h * dim_head
        hi = lo + dim_head
        qh = qkv[:, :, lo:hi]                                        # (BB, N, dh)
        kh = qkv[:, :, HD + lo:HD + hi]                              # (BB, N, dh)
        vh = qkv[:, :, 2 * HD + lo:2 * HD + hi]                      # (BB, N, dh)

        # scores: contract dh of q with dh of k (batched over BB); no transpose.
        s = jax.lax.dot_general(
            qh, kh,
            dimension_numbers=(((2,), (2,)), ((0,), (0,))),
            preferred_element_type=jnp.float32)                      # (BB, N, N) f32

        # Softmax in f32 (v5e VPU/EUP have no bf16); approx reciprocal -> EUP.
        m = jnp.max(s, axis=-1, keepdims=True)
        p = jnp.exp(s - m)
        l = jnp.sum(p, axis=-1, keepdims=True)
        att = (p * pl.reciprocal(l, approx=True)).astype(jnp.bfloat16)

        # out_h = att @ v  (batched over BB)
        oh = jax.lax.dot_general(
            att, vh,
            dimension_numbers=(((2,), (1,)), ((0,), (0,))),
            preferred_element_type=jnp.float32)                      # (BB, N, dh) f32

        # Accumulate unify_heads: acc += out_h @ W_u[h*dh:(h+1)*dh, :]
        acc = acc + jnp.dot(
            oh.reshape(BB * N, dim_head).astype(jnp.bfloat16),
            wu[lo:hi, :],
            preferred_element_type=jnp.float32)                      # (BB*N, D) f32

    y = acc + bu                                                     # bias added once
    # NOTE: D=32 (<128 lanes) => masked stores; a lane-dense (BB, N*D) slab
    # output would need an in-kernel relayout that isn't worth it at this size.
    o_ref[...] = y.reshape(BB, N, D).astype(o_ref.dtype)

    # NOTE: for long sequences the (N, N) score matrix should not be
    # materialized per head; switch to a KV-tiled online-softmax (flash)
    # pattern — irrelevant at these shapes.


def _batch_block(B):
    """Batches per grid step.

    v5e/v6e have a single TensorCore per chip, so the grid is a serial loop:
    one big step avoids the ~0.35 us per-step pipeline overhead.  v7x has
    2 TensorCores, so keep >=2 parallel grid steps to use both cores.
    """
    try:
        kind = jax.devices()[0].device_kind.lower()
    except Exception:
        kind = ""
    n_tc = 2 if ("v7" in kind or "7x" in kind) else 1
    if n_tc > 1 and B % n_tc == 0:
        return B // n_tc
    return B if n_tc == 1 else 1


def self_attention(x, wq, wk, wv, wu, bu, *, heads, dim_head):
    B, N, D = x.shape
    HD = heads * dim_head
    scale = dim_head ** (-0.5)

    # One-time weight prep: fold the softmax scale into W_q, fuse Q/K/V into a
    # single (D, 3*HD) operand, and cast MXU weight operands to bf16
    # (halves weight DMA; f32 accumulation happens in-kernel).
    w_qkv = jnp.concatenate([wq * scale, wk, wv], axis=1).astype(jnp.bfloat16)
    wu_bf = wu.astype(jnp.bfloat16)
    bu2 = bu.reshape(1, D).astype(jnp.float32)

    bb = _batch_block(B)
    grid = (B // bb,)

    kernel = functools.partial(
        self_attention_kernel, heads=heads, dim_head=dim_head)

    return pl.pallas_call(
        kernel,
        out_shape=jax.ShapeDtypeStruct((B, N, D), x.dtype),
        grid_spec=pltpu.PrefetchScalarGridSpec(
            num_scalar_prefetch=0,
            grid=grid,
            in_specs=[
                pl.BlockSpec((bb, N, D), lambda b: (b, 0, 0)),       # x tile
                # Constant-index weight operands (could be single-buffered via
                # pipeline_mode=pl.Buffered(1) if VMEM becomes tight on v7x).
                pl.BlockSpec((D, 3 * HD), lambda b: (0, 0)),         # fused W_qkv
                pl.BlockSpec((HD, D), lambda b: (0, 0)),             # W_unify
                pl.BlockSpec((1, D), lambda b: (0, 0)),              # b_unify
            ],
            out_specs=pl.BlockSpec((bb, N, D), lambda b: (b, 0, 0)),
        ),
        compiler_params=pltpu.CompilerParams(
            dimension_semantics=("parallel",)),
    )(x, w_qkv, wu_bf, bu2)


def reference(x, wq, wk, wv, wu, bu, *, heads, dim_head):
    """Pure-JAX f32 reference mirroring the PyTorch forward."""
    B, N, D = x.shape
    scale = dim_head ** (-0.5)
    q = (x @ wq).reshape(B, N, heads, dim_head).transpose(0, 2, 1, 3)
    k = (x @ wk).reshape(B, N, heads, dim_head).transpose(0, 2, 1, 3)
    v = (x @ wv).reshape(B, N, heads, dim_head).transpose(0, 2, 1, 3)
    dot = jnp.einsum('bhnd,bhkd->bhnk', q, k) * scale
    att = jax.nn.softmax(dot, axis=-1)
    out = jnp.einsum('bhnk,bhkd->bhnd', att, v)
    out = out.transpose(0, 2, 1, 3).reshape(B, N, heads * dim_head)
    return out @ wu + bu


if __name__ == "__main__":
    # SelfAttention defaults: dim_head=32, heads=8; choose input_dim=32, seq=8, batch=2.
    B, N, D = 2, 8, 32
    heads, dim_head = 8, 32
    HD = heads * dim_head

    key = jax.random.PRNGKey(0)
    kx, kq, kk, kv, ku, kb = jax.random.split(key, 6)

    x = jax.random.normal(kx, (B, N, D), dtype=jnp.float32)
    # Deterministic synthetic parameters (PyTorch Linear weights, pre-transposed).
    wq = jax.random.normal(kq, (D, HD), dtype=jnp.float32) * 0.05
    wk = jax.random.normal(kk, (D, HD), dtype=jnp.float32) * 0.05
    wv = jax.random.normal(kv, (D, HD), dtype=jnp.float32) * 0.05
    wu = jax.random.normal(ku, (HD, D), dtype=jnp.float32) * 0.05
    bu = jax.random.normal(kb, (D,), dtype=jnp.float32) * 0.05

    out = self_attention(x, wq, wk, wv, wu, bu, heads=heads, dim_head=dim_head)
    out = jax.block_until_ready(out)

    ref = reference(x, wq, wk, wv, wu, bu, heads=heads, dim_head=dim_head)
    assert out.shape == (B, N, D)
    # bf16 MXU operands (f32 accumulation) + approx reciprocal => ~1e-3 abs error
    # vs. the pure-f32 reference, well within this tolerance.
    assert jnp.allclose(out, ref, atol=2e-2, rtol=2e-2), \
        f"max abs err {jnp.max(jnp.abs(out - ref))}"

    print("KERNEL_OK")
</pallas_src>

<mosaic_0001>
module attributes {stable_mosaic.version = 11 : i64} {
  func.func @self_attention_kernel(%arg0: i32, %arg1: memref<2x8x32xf32, #tpu.memory_space<vmem>>, %arg2: memref<32x768xbf16, #tpu.memory_space<vmem>>, %arg3: memref<256x32xbf16, #tpu.memory_space<vmem>>, %arg4: memref<1x32xf32, #tpu.memory_space<vmem>>, %arg5: memref<2x8x32xf32, #tpu.memory_space<vmem>>) attributes {dimension_semantics = [#tpu.dimension_semantics<parallel>], iteration_bounds = array<i64: 1>, scalar_prefetch = 0 : i64, scratch_operands = 0 : i64, tpu.core_type = #tpu.core_type<tc>, window_params = [{transform_indices = @transform_0, window_bounds = array<i64: 2, 8, 32>}, {pipeline_mode = #tpu.pipeline_mode<synchronous>, transform_indices = @transform_1, window_bounds = array<i64: 32, 768>}, {pipeline_mode = #tpu.pipeline_mode<synchronous>, transform_indices = @transform_2, window_bounds = array<i64: 256, 32>}, {pipeline_mode = #tpu.pipeline_mode<synchronous>, transform_indices = @transform_3, window_bounds = array<i64: 1, 32>}, {transform_indices = @transform_4, window_bounds = array<i64: 2, 8, 32>}]} {
    %c0 = arith.constant 0 : index
    %c0_0 = arith.constant 0 : index
    %c0_1 = arith.constant 0 : index
    %0 = vector.load %arg1[%c0, %c0_0, %c0_1] : memref<2x8x32xf32, #tpu.memory_space<vmem>>, vector<2x8x32xf32>
    %1 = vector.shape_cast %0 : vector<2x8x32xf32> to vector<16x32xf32>
    %2 = arith.truncf %1 : vector<16x32xf32> to vector<16x32xbf16>
    %c0_2 = arith.constant 0 : index
    %c0_3 = arith.constant 0 : index
    %3 = vector.load %arg2[%c0_2, %c0_3] : memref<32x768xbf16, #tpu.memory_space<vmem>>, vector<32x768xbf16>
    %cst = arith.constant dense<0.000000e+00> : vector<16x768xf32>
    %4 = tpu.matmul %2, %3, %cst {dimension_numbers = #tpu.dot_dimension_numbers<[1], [0], [0], [1], [0, 0, 1, 1], [], []>} : vector<16x32xbf16>, vector<32x768xbf16>, vector<16x768xf32> -> vector<16x768xf32>
    %5 = vector.shape_cast %4 : vector<16x768xf32> to vector<2x8x768xf32>
    %6 = arith.truncf %5 : vector<2x8x768xf32> to vector<2x8x768xbf16>
    %c0_4 = arith.constant 0 : index
    %c0_5 = arith.constant 0 : index
    %7 = vector.load %arg3[%c0_4, %c0_5] : memref<256x32xbf16, #tpu.memory_space<vmem>>, vector<256x32xbf16>
    %c0_6 = arith.constant 0 : index
    %c0_7 = arith.constant 0 : index
    %8 = vector.load %arg4[%c0_6, %c0_7] : memref<1x32xf32, #tpu.memory_space<vmem>>, vector<1x32xf32>
    %cst_8 = arith.constant 0.000000e+00 : f32
    %9 = vector.broadcast %cst_8 : f32 to vector<16x32xf32>
    %10 = vector.extract_strided_slice %6 {offsets = [0, 0, 0], sizes = [2, 8, 32], strides = [1, 1, 1]} : vector<2x8x768xbf16> to vector<2x8x32xbf16>
    %11 = vector.extract_strided_slice %6 {offsets = [0, 0, 256], sizes = [2, 8, 32], strides = [1, 1, 1]} : vector<2x8x768xbf16> to vector<2x8x32xbf16>
    %12 = vector.extract_strided_slice %6 {offsets = [0, 0, 512], sizes = [2, 8, 32], strides = [1, 1, 1]} : vector<2x8x768xbf16> to vector<2x8x32xbf16>
    %cst_9 = arith.constant dense<0.000000e+00> : vector<2x8x8xf32>
    %13 = tpu.matmul %10, %11, %cst_9 {dimension_numbers = #tpu.dot_dimension_numbers<[2], [2], [1], [1], [0, 0, 0, 1, 1, 1], [0], [0]>} : vector<2x8x32xbf16>, vector<2x8x32xbf16>, vector<2x8x8xf32> -> vector<2x8x8xf32>
    %cst_10 = arith.constant dense<0xFF800000> : vector<2x8xf32>
    %14 = vector.multi_reduction <maximumf>, %13, %cst_10 [2] : vector<2x8x8xf32> to vector<2x8xf32>
    %15 = vector.shape_cast %14 : vector<2x8xf32> to vector<2x8x1xf32>
    %16 = vector.broadcast %15 : vector<2x8x1xf32> to vector<2x8x8xf32>
    %17 = arith.subf %13, %16 : vector<2x8x8xf32>
    %18 = math.exp %17 : vector<2x8x8xf32>
    %cst_11 = arith.constant dense<0.000000e+00> : vector<2x8xf32>
    %19 = vector.multi_reduction <add>, %18, %cst_11 [2] : vector<2x8x8xf32> to vector<2x8xf32>
    %20 = vector.shape_cast %19 : vector<2x8xf32> to vector<2x8x1xf32>
    %21 = tpu.reciprocal %20 {approx = true} : vector<2x8x1xf32> -> vector<2x8x1xf32>
    %22 = vector.broadcast %21 : vector<2x8x1xf32> to vector<2x8x8xf32>
    %23 = arith.mulf %18, %22 : vector<2x8x8xf32>
    %24 = arith.truncf %23 : vector<2x8x8xf32> to vector<2x8x8xbf16>
    %cst_12 = arith.constant dense<0.000000e+00> : vector<2x8x32xf32>
    %25 = tpu.matmul %24, %12, %cst_12 {dimension_numbers = #tpu.dot_dimension_numbers<[2], [1], [1], [2], [0, 0, 0, 1, 1, 2], [0], [0]>} : vector<2x8x8xbf16>, vector<2x8x32xbf16>, vector<2x8x32xf32> -> vector<2x8x32xf32>
    %26 = vector.shape_cast %25 : vector<2x8x32xf32> to vector<16x32xf32>
    %27 = arith.truncf %26 : vector<16x32xf32> to vector<16x32xbf16>
    %28 = vector.extract_strided_slice %7 {offsets = [0, 0], sizes = [32, 32], strides = [1, 1]} : vector<256x32xbf16> to vector<32x32xbf16>
    %cst_13 = arith.constant dense<0.000000e+00> : vector<16x32xf32>
    %29 = tpu.matmul %27, %28, %cst_13 {dimension_numbers = #tpu.dot_dimension_numbers<[1], [0], [0], [1], [0, 0, 1, 1], [], []>} : vector<16x32xbf16>, vector<32x32xbf16>, vector<16x32xf32> -> vector<16x32xf32>
    %30 = arith.addf %9, %29 : vector<16x32xf32>
    %31 = vector.extract_strided_slice %6 {offsets = [0, 0, 32], sizes = [2, 8, 32], strides = [1, 1, 1]} : vector<2x8x768xbf16> to vector<2x8x32xbf16>
    %32 = vector.extract_strided_slice %6 {offsets = [0, 0, 288], sizes = [2, 8, 32], strides = [1, 1, 1]} : vector<2x8x768xbf16> to vector<2x8x32xbf16>
    %33 = vector.extract_strided_slice %6 {offsets = [0, 0, 544], sizes = [2, 8, 32], strides = [1, 1, 1]} : vector<2x8x768xbf16> to vector<2x8x32xbf16>
    %cst_14 = arith.constant dense<0.000000e+00> : vector<2x8x8xf32>
    %34 = tpu.matmul %31, %32, %cst_14 {dimension_numbers = #tpu.dot_dimension_numbers<[2], [2], [1], [1], [0, 0, 0, 1, 1, 1], [0], [0]>} : vector<2x8x32xbf16>, vector<2x8x32xbf16>, vector<2x8x8xf32> -> vector<2x8x8xf32>
    %cst_15 = arith.constant dense<0xFF800000> : vector<2x8xf32>
    %35 = vector.multi_reduction <maximumf>, %34, %cst_15 [2] : vector<2x8x8xf32> to vector<2x8xf32>
    %36 = vector.shape_cast %35 : vector<2x8xf32> to vector<2x8x1xf32>
    %37 = vector.broadcast %36 : vector<2x8x1xf32> to vector<2x8x8xf32>
    %38 = arith.subf %34, %37 : vector<2x8x8xf32>
    %39 = math.exp %38 : vector<2x8x8xf32>
    %cst_16 = arith.constant dense<0.000000e+00> : vector<2x8xf32>
    %40 = vector.multi_reduction <add>, %39, %cst_16 [2] : vector<2x8x8xf32> to vector<2x8xf32>
    %41 = vector.shape_cast %40 : vector<2x8xf32> to vector<2x8x1xf32>
    %42 = tpu.reciprocal %41 {approx = true} : vector<2x8x1xf32> -> vector<2x8x1xf32>
    %43 = vector.broadcast %42 : vector<2x8x1xf32> to vector<2x8x8xf32>
    %44 = arith.mulf %39, %43 : vector<2x8x8xf32>
    %45 = arith.truncf %44 : vector<2x8x8xf32> to vector<2x8x8xbf16>
    %cst_17 = arith.constant dense<0.000000e+00> : vector<2x8x32xf32>
    %46 = tpu.matmul %45, %33, %cst_17 {dimension_numbers = #tpu.dot_dimension_numbers<[2], [1], [1], [2], [0, 0, 0, 1, 1, 2], [0], [0]>} : vector<2x8x8xbf16>, vector<2x8x32xbf16>, vector<2x8x32xf32> -> vector<2x8x32xf32>
    %47 = vector.shape_cast %46 : vector<2x8x32xf32> to vector<16x32xf32>
    %48 = arith.truncf %47 : vector<16x32xf32> to vector<16x32xbf16>
    %49 = vector.extract_strided_slice %7 {offsets = [32, 0], sizes = [32, 32], strides = [1, 1]} : vector<256x32xbf16> to vector<32x32xbf16>
    %cst_18 = arith.constant dense<0.000000e+00> : vector<16x32xf32>
    %50 = tpu.matmul %48, %49, %cst_18 {dimension_numbers = #tpu.dot_dimension_numbers<[1], [0], [0], [1], [0, 0, 1, 1], [], []>} : vector<16x32xbf16>, vector<32x32xbf16>, vector<16x32xf32> -> vector<16x32xf32>
    %51 = arith.addf %30, %50 : vector<16x32xf32>
    %52 = vector.extract_strided_slice %6 {offsets = [0, 0, 64], sizes = [2, 8, 32], strides = [1, 1, 1]} : vector<2x8x768xbf16> to vector<2x8x32xbf16>
    %53 = vector.extract_strided_slice %6 {offsets = [0, 0, 320], sizes = [2, 8, 32], strides = [1, 1, 1]} : vector<2x8x768xbf16> to vector<2x8x32xbf16>
    %54 = vector.extract_strided_slice %6 {offsets = [0, 0, 576], sizes = [2, 8, 32], strides = [1, 1, 1]} : vector<2x8x768xbf16> to vector<2x8x32xbf16>
    %cst_19 = arith.constant dense<0.000000e+00> : vector<2x8x8xf32>
    %55 = tpu.matmul %52, %53, %cst_19 {dimension_numbers = #tpu.dot_dimension_numbers<[2], [2], [1], [1], [0, 0, 0, 1, 1, 1], [0], [0]>} : vector<2x8x32xbf16>, vector<2x8x32xbf16>, vector<2x8x8xf32> -> vector<2x8x8xf32>
    %cst_20 = arith.constant dense<0xFF800000> : vector<2x8xf32>
    %56 = vector.multi_reduction <maximumf>, %55, %cst_20 [2] : vector<2x8x8xf32> to vector<2x8xf32>
    %57 = vector.shape_cast %56 : vector<2x8xf32> to vector<2x8x1xf32>
    %58 = vector.broadcast %57 : vector<2x8x1xf32> to vector<2x8x8xf32>
    %59 = arith.subf %55, %58 : vector<2x8x8xf32>
    %60 = math.exp %59 : vector<2x8x8xf32>
    %cst_21 = arith.constant dense<0.000000e+00> : vector<2x8xf32>
    %61 = vector.multi_reduction <add>, %60, %cst_21 [2] : vector<2x8x8xf32> to vector<2x8xf32>
    %62 = vector.shape_cast %61 : vector<2x8xf32> to vector<2x8x1xf32>
    %63 = tpu.reciprocal %62 {approx = true} : vector<2x8x1xf32> -> vector<2x8x1xf32>
    %64 = vector.broadcast %63 : vector<2x8x1xf32> to vector<2x8x8xf32>
    %65 = arith.mulf %60, %64 : vector<2x8x8xf32>
    %66 = arith.truncf %65 : vector<2x8x8xf32> to vector<2x8x8xbf16>
    %cst_22 = arith.constant dense<0.000000e+00> : vector<2x8x32xf32>
    %67 = tpu.matmul %66, %54, %cst_22 {dimension_numbers = #tpu.dot_dimension_numbers<[2], [1], [1], [2], [0, 0, 0, 1, 1, 2], [0], [0]>} : vector<2x8x8xbf16>, vector<2x8x32xbf16>, vector<2x8x32xf32> -> vector<2x8x32xf32>
    %68 = vector.shape_cast %67 : vector<2x8x32xf32> to vector<16x32xf32>
    %69 = arith.truncf %68 : vector<16x32xf32> to vector<16x32xbf16>
    %70 = vector.extract_strided_slice %7 {offsets = [64, 0], sizes = [32, 32], strides = [1, 1]} : vector<256x32xbf16> to vector<32x32xbf16>
    %cst_23 = arith.constant dense<0.000000e+00> : vector<16x32xf32>
    %71 = tpu.matmul %69, %70, %cst_23 {dimension_numbers = #tpu.dot_dimension_numbers<[1], [0], [0], [1], [0, 0, 1, 1], [], []>} : vector<16x32xbf16>, vector<32x32xbf16>, vector<16x32xf32> -> vector<16x32xf32>
    %72 = arith.addf %51, %71 : vector<16x32xf32>
    %73 = vector.extract_strided_slice %6 {offsets = [0, 0, 96], sizes = [2, 8, 32], strides = [1, 1, 1]} : vector<2x8x768xbf16> to vector<2x8x32xbf16>
    %74 = vector.extract_strided_slice %6 {offsets = [0, 0, 352], sizes = [2, 8, 32], strides = [1, 1, 1]} : vector<2x8x768xbf16> to vector<2x8x32xbf16>
    %75 = vector.extract_strided_slice %6 {offsets = [0, 0, 608], sizes = [2, 8, 32], strides = [1, 1, 1]} : vector<2x8x768xbf16> to vector<2x8x32xbf16>
    %cst_24 = arith.constant dense<0.000000e+00> : vector<2x8x8xf32>
    %76 = tpu.matmul %73, %74, %cst_24 {dimension_numbers = #tpu.dot_dimension_numbers<[2], [2], [1], [1], [0, 0, 0, 1, 1, 1], [0], [0]>} : vector<2x8x32xbf16>, vector<2x8x32xbf16>, vector<2x8x8xf32> -> vector<2x8x8xf32>
    %cst_25 = arith.constant dense<0xFF800000> : vector<2x8xf32>
    %77 = vector.multi_reduction <maximumf>, %76, %cst_25 [2] : vector<2x8x8xf32> to vector<2x8xf32>
    %78 = vector.shape_cast %77 : vector<2x8xf32> to vector<2x8x1xf32>
    %79 = vector.broadcast %78 : vector<2x8x1xf32> to vector<2x8x8xf32>
    %80 = arith.subf %76, %79 : vector<2x8x8xf32>
    %81 = math.exp %80 : vector<2x8x8xf32>
    %cst_26 = arith.constant dense<0.000000e+00> : vector<2x8xf32>
    %82 = vector.multi_reduction <add>, %81, %cst_26 [2] : vector<2x8x8xf32> to vector<2x8xf32>
    %83 = vector.shape_cast %82 : vector<2x8xf32> to vector<2x8x1xf32>
    %84 = tpu.reciprocal %83 {approx = true} : vector<2x8x1xf32> -> vector<2x8x1xf32>
    %85 = vector.broadcast %84 : vector<2x8x1xf32> to vector<2x8x8xf32>
    %86 = arith.mulf %81, %85 : vector<2x8x8xf32>
    %87 = arith.truncf %86 : vector<2x8x8xf32> to vector<2x8x8xbf16>
    %cst_27 = arith.constant dense<0.000000e+00> : vector<2x8x32xf32>
    %88 = tpu.matmul %87, %75, %cst_27 {dimension_numbers = #tpu.dot_dimension_numbers<[2], [1], [1], [2], [0, 0, 0, 1, 1, 2], [0], [0]>} : vector<2x8x8xbf16>, vector<2x8x32xbf16>, vector<2x8x32xf32> -> vector<2x8x32xf32>
    %89 = vector.shape_cast %88 : vector<2x8x32xf32> to vector<16x32xf32>
    %90 = arith.truncf %89 : vector<16x32xf32> to vector<16x32xbf16>
    %91 = vector.extract_strided_slice %7 {offsets = [96, 0], sizes = [32, 32], strides = [1, 1]} : vector<256x32xbf16> to vector<32x32xbf16>
    %cst_28 = arith.constant dense<0.000000e+00> : vector<16x32xf32>
    %92 = tpu.matmul %90, %91, %cst_28 {dimension_numbers = #tpu.dot_dimension_numbers<[1], [0], [0], [1], [0, 0, 1, 1], [], []>} : vector<16x32xbf16>, vector<32x32xbf16>, vector<16x32xf32> -> vector<16x32xf32>
    %93 = arith.addf %72, %92 : vector<16x32xf32>
    %94 = vector.extract_strided_slice %6 {offsets = [0, 0, 128], sizes = [2, 8, 32], strides = [1, 1, 1]} : vector<2x8x768xbf16> to vector<2x8x32xbf16>
    %95 = vector.extract_strided_slice %6 {offsets = [0, 0, 384], sizes = [2, 8, 32], strides = [1, 1, 1]} : vector<2x8x768xbf16> to vector<2x8x32xbf16>
    %96 = vector.extract_strided_slice %6 {offsets = [0, 0, 640], sizes = [2, 8, 32], strides = [1, 1, 1]} : vector<2x8x768xbf16> to vector<2x8x32xbf16>
    %cst_29 = arith.constant dense<0.000000e+00> : vector<2x8x8xf32>
    %97 = tpu.matmul %94, %95, %cst_29 {dimension_numbers = #tpu.dot_dimension_numbers<[2], [2], [1], [1], [0, 0, 0, 1, 1, 1], [0], [0]>} : vector<2x8x32xbf16>, vector<2x8x32xbf16>, vector<2x8x8xf32> -> vector<2x8x8xf32>
    %cst_30 = arith.constant dense<0xFF800000> : vector<2x8xf32>
    %98 = vector.multi_reduction <maximumf>, %97, %cst_30 [2] : vector<2x8x8xf32> to vector<2x8xf32>
    %99 = vector.shape_cast %98 : vector<2x8xf32> to vector<2x8x1xf32>
    %100 = vector.broadcast %99 : vector<2x8x1xf32> to vector<2x8x8xf32>
    %101 = arith.subf %97, %100 : vector<2x8x8xf32>
    %102 = math.exp %101 : vector<2x8x8xf32>
    %cst_31 = arith.constant dense<0.000000e+00> : vector<2x8xf32>
    %103 = vector.multi_reduction <add>, %102, %cst_31 [2] : vector<2x8x8xf32> to vector<2x8xf32>
    %104 = vector.shape_cast %103 : vector<2x8xf32> to vector<2x8x1xf32>
    %105 = tpu.reciprocal %104 {approx = true} : vector<2x8x1xf32> -> vector<2x8x1xf32>
    %106 = vector.broadcast %105 : vector<2x8x1xf32> to vector<2x8x8xf32>
    %107 = arith.mulf %102, %106 : vector<2x8x8xf32>
    %108 = arith.truncf %107 : vector<2x8x8xf32> to vector<2x8x8xbf16>
    %cst_32 = arith.constant dense<0.000000e+00> : vector<2x8x32xf32>
    %109 = tpu.matmul %108, %96, %cst_32 {dimension_numbers = #tpu.dot_dimension_numbers<[2], [1], [1], [2], [0, 0, 0, 1, 1, 2], [0], [0]>} : vector<2x8x8xbf16>, vector<2x8x32xbf16>, vector<2x8x32xf32> -> vector<2x8x32xf32>
    %110 = vector.shape_cast %109 : vector<2x8x32xf32> to vector<16x32xf32>
    %111 = arith.truncf %110 : vector<16x32xf32> to vector<16x32xbf16>
    %112 = vector.extract_strided_slice %7 {offsets = [128, 0], sizes = [32, 32], strides = [1, 1]} : vector<256x32xbf16> to vector<32x32xbf16>
    %cst_33 = arith.constant dense<0.000000e+00> : vector<16x32xf32>
    %113 = tpu.matmul %111, %112, %cst_33 {dimension_numbers = #tpu.dot_dimension_numbers<[1], [0], [0], [1], [0, 0, 1, 1], [], []>} : vector<16x32xbf16>, vector<32x32xbf16>, vector<16x32xf32> -> vector<16x32xf32>
    %114 = arith.addf %93, %113 : vector<16x32xf32>
    %115 = vector.extract_strided_slice %6 {offsets = [0, 0, 160], sizes = [2, 8, 32], strides = [1, 1, 1]} : vector<2x8x768xbf16> to vector<2x8x32xbf16>
    %116 = vector.extract_strided_slice %6 {offsets = [0, 0, 416], sizes = [2, 8, 32], strides = [1, 1, 1]} : vector<2x8x768xbf16> to vector<2x8x32xbf16>
    %117 = vector.extract_strided_slice %6 {offsets = [0, 0, 672], sizes = [2, 8, 32], strides = [1, 1, 1]} : vector<2x8x768xbf16> to vector<2x8x32xbf16>
    %cst_34 = arith.constant dense<0.000000e+00> : vector<2x8x8xf32>
    %118 = tpu.matmul %115, %116, %cst_34 {dimension_numbers = #tpu.dot_dimension_numbers<[2], [2], [1], [1], [0, 0, 0, 1, 1, 1], [0], [0]>} : vector<2x8x32xbf16>, vector<2x8x32xbf16>, vector<2x8x8xf32> -> vector<2x8x8xf32>
    %cst_35 = arith.constant dense<0xFF800000> : vector<2x8xf32>
    %119 = vector.multi_reduction <maximumf>, %118, %cst_35 [2] : vector<2x8x8xf32> to vector<2x8xf32>
    %120 = vector.shape_cast %119 : vector<2x8xf32> to vector<2x8x1xf32>
    %121 = vector.broadcast %120 : vector<2x8x1xf32> to vector<2x8x8xf32>
    %122 = arith.subf %118, %121 : vector<2x8x8xf32>
    %123 = math.exp %122 : vector<2x8x8xf32>
    %cst_36 = arith.constant dense<0.000000e+00> : vector<2x8xf32>
    %124 = vector.multi_reduction <add>, %123, %cst_36 [2] : vector<2x8x8xf32> to vector<2x8xf32>
    %125 = vector.shape_cast %124 : vector<2x8xf32> to vector<2x8x1xf32>
    %126 = tpu.reciprocal %125 {approx = true} : vector<2x8x1xf32> -> vector<2x8x1xf32>
    %127 = vector.broadcast %126 : vector<2x8x1xf32> to vector<2x8x8xf32>
    %128 = arith.mulf %123, %127 : vector<2x8x8xf32>
    %129 = arith.truncf %128 : vector<2x8x8xf32> to vector<2x8x8xbf16>
    %cst_37 = arith.constant dense<0.000000e+00> : vector<2x8x32xf32>
    %130 = tpu.matmul %129, %117, %cst_37 {dimension_numbers = #tpu.dot_dimension_numbers<[2], [1], [1], [2], [0, 0, 0, 1, 1, 2], [0], [0]>} : vector<2x8x8xbf16>, vector<2x8x32xbf16>, vector<2x8x32xf32> -> vector<2x8x32xf32>
    %131 = vector.shape_cast %130 : vector<2x8x32xf32> to vector<16x32xf32>
    %132 = arith.truncf %131 : vector<16x32xf32> to vector<16x32xbf16>
    %133 = vector.extract_strided_slice %7 {offsets = [160, 0], sizes = [32, 32], strides = [1, 1]} : vector<256x32xbf16> to vector<32x32xbf16>
    %cst_38 = arith.constant dense<0.000000e+00> : vector<16x32xf32>
    %134 = tpu.matmul %132, %133, %cst_38 {dimension_numbers = #tpu.dot_dimension_numbers<[1], [0], [0], [1], [0, 0, 1, 1], [], []>} : vector<16x32xbf16>, vector<32x32xbf16>, vector<16x32xf32> -> vector<16x32xf32>
    %135 = arith.addf %114, %134 : vector<16x32xf32>
    %136 = vector.extract_strided_slice %6 {offsets = [0, 0, 192], sizes = [2, 8, 32], strides = [1, 1, 1]} : vector<2x8x768xbf16> to vector<2x8x32xbf16>
    %137 = vector.extract_strided_slice %6 {offsets = [0, 0, 448], sizes = [2, 8, 32], strides = [1, 1, 1]} : vector<2x8x768xbf16> to vector<2x8x32xbf16>
    %138 = vector.extract_strided_slice %6 {offsets = [0, 0, 704], sizes = [2, 8, 32], strides = [1, 1, 1]} : vector<2x8x768xbf16> to vector<2x8x32xbf16>
    %cst_39 = arith.constant dense<0.000000e+00> : vector<2x8x8xf32>
    %139 = tpu.matmul %136, %137, %cst_39 {dimension_numbers = #tpu.dot_dimension_numbers<[2], [2], [1], [1], [0, 0, 0, 1, 1, 1], [0], [0]>} : vector<2x8x32xbf16>, vector<2x8x32xbf16>, vector<2x8x8xf32> -> vector<2x8x8xf32>
    %cst_40 = arith.constant dense<0xFF800000> : vector<2x8xf32>
    %140 = vector.multi_reduction <maximumf>, %139, %cst_40 [2] : vector<2x8x8xf32> to vector<2x8xf32>
    %141 = vector.shape_cast %140 : vector<2x8xf32> to vector<2x8x1xf32>
    %142 = vector.broadcast %141 : vector<2x8x1xf32> to vector<2x8x8xf32>
    %143 = arith.subf %139, %142 : vector<2x8x8xf32>
    %144 = math.exp %143 : vector<2x8x8xf32>
    %cst_41 = arith.constant dense<0.000000e+00> : vector<2x8xf32>
    %145 = vector.multi_reduction <add>, %144, %cst_41 [2] : vector<2x8x8xf32> to vector<2x8xf32>
    %146 = vector.shape_cast %145 : vector<2x8xf32> to vector<2x8x1xf32>
    %147 = tpu.reciprocal %146 {approx = true} : vector<2x8x1xf32> -> vector<2x8x1xf32>
    %148 = vector.broadcast %147 : vector<2x8x1xf32> to vector<2x8x8xf32>
    %149 = arith.mulf %144, %148 : vector<2x8x8xf32>
    %150 = arith.truncf %149 : vector<2x8x8xf32> to vector<2x8x8xbf16>
    %cst_42 = arith.constant dense<0.000000e+00> : vector<2x8x32xf32>
    %151 = tpu.matmul %150, %138, %cst_42 {dimension_numbers = #tpu.dot_dimension_numbers<[2], [1], [1], [2], [0, 0, 0, 1, 1, 2], [0], [0]>} : vector<2x8x8xbf16>, vector<2x8x32xbf16>, vector<2x8x32xf32> -> vector<2x8x32xf32>
    %152 = vector.shape_cast %151 : vector<2x8x32xf32> to vector<16x32xf32>
    %153 = arith.truncf %152 : vector<16x32xf32> to vector<16x32xbf16>
    %154 = vector.extract_strided_slice %7 {offsets = [192, 0], sizes = [32, 32], strides = [1, 1]} : vector<256x32xbf16> to vector<32x32xbf16>
    %cst_43 = arith.constant dense<0.000000e+00> : vector<16x32xf32>
    %155 = tpu.matmul %153, %154, %cst_43 {dimension_numbers = #tpu.dot_dimension_numbers<[1], [0], [0], [1], [0, 0, 1, 1], [], []>} : vector<16x32xbf16>, vector<32x32xbf16>, vector<16x32xf32> -> vector<16x32xf32>
    %156 = arith.addf %135, %155 : vector<16x32xf32>
    %157 = vector.extract_strided_slice %6 {offsets = [0, 0, 224], sizes = [2, 8, 32], strides = [1, 1, 1]} : vector<2x8x768xbf16> to vector<2x8x32xbf16>
    %158 = vector.extract_strided_slice %6 {offsets = [0, 0, 480], sizes = [2, 8, 32], strides = [1, 1, 1]} : vector<2x8x768xbf16> to vector<2x8x32xbf16>
    %159 = vector.extract_strided_slice %6 {offsets = [0, 0, 736], sizes = [2, 8, 32], strides = [1, 1, 1]} : vector<2x8x768xbf16> to vector<2x8x32xbf16>
    %cst_44 = arith.constant dense<0.000000e+00> : vector<2x8x8xf32>
    %160 = tpu.matmul %157, %158, %cst_44 {dimension_numbers = #tpu.dot_dimension_numbers<[2], [2], [1], [1], [0, 0, 0, 1, 1, 1], [0], [0]>} : vector<2x8x32xbf16>, vector<2x8x32xbf16>, vector<2x8x8xf32> -> vector<2x8x8xf32>
    %cst_45 = arith.constant dense<0xFF800000> : vector<2x8xf32>
    %161 = vector.multi_reduction <maximumf>, %160, %cst_45 [2] : vector<2x8x8xf32> to vector<2x8xf32>
    %162 = vector.shape_cast %161 : vector<2x8xf32> to vector<2x8x1xf32>
    %163 = vector.broadcast %162 : vector<2x8x1xf32> to vector<2x8x8xf32>
    %164 = arith.subf %160, %163 : vector<2x8x8xf32>
    %165 = math.exp %164 : vector<2x8x8xf32>
    %cst_46 = arith.constant dense<0.000000e+00> : vector<2x8xf32>
    %166 = vector.multi_reduction <add>, %165, %cst_46 [2] : vector<2x8x8xf32> to vector<2x8xf32>
    %167 = vector.shape_cast %166 : vector<2x8xf32> to vector<2x8x1xf32>
    %168 = tpu.reciprocal %167 {approx = true} : vector<2x8x1xf32> -> vector<2x8x1xf32>
    %169 = vector.broadcast %168 : vector<2x8x1xf32> to vector<2x8x8xf32>
    %170 = arith.mulf %165, %169 : vector<2x8x8xf32>
    %171 = arith.truncf %170 : vector<2x8x8xf32> to vector<2x8x8xbf16>
    %cst_47 = arith.constant dense<0.000000e+00> : vector<2x8x32xf32>
    %172 = tpu.matmul %171, %159, %cst_47 {dimension_numbers = #tpu.dot_dimension_numbers<[2], [1], [1], [2], [0, 0, 0, 1, 1, 2], [0], [0]>} : vector<2x8x8xbf16>, vector<2x8x32xbf16>, vector<2x8x32xf32> -> vector<2x8x32xf32>
    %173 = vector.shape_cast %172 : vector<2x8x32xf32> to vector<16x32xf32>
    %174 = arith.truncf %173 : vector<16x32xf32> to vector<16x32xbf16>
    %175 = vector.extract_strided_slice %7 {offsets = [224, 0], sizes = [32, 32], strides = [1, 1]} : vector<256x32xbf16> to vector<32x32xbf16>
    %cst_48 = arith.constant dense<0.000000e+00> : vector<16x32xf32>
    %176 = tpu.matmul %174, %175, %cst_48 {dimension_numbers = #tpu.dot_dimension_numbers<[1], [0], [0], [1], [0, 0, 1, 1], [], []>} : vector<16x32xbf16>, vector<32x32xbf16>, vector<16x32xf32> -> vector<16x32xf32>
    %177 = arith.addf %156, %176 : vector<16x32xf32>
    %178 = vector.broadcast %8 : vector<1x32xf32> to vector<16x32xf32>
    %179 = arith.addf %177, %178 : vector<16x32xf32>
    %180 = vector.shape_cast %179 : vector<16x32xf32> to vector<2x8x32xf32>
    %c0_49 = arith.constant 0 : index
    %c0_50 = arith.constant 0 : index
    %c0_51 = arith.constant 0 : index
    %181 = vector.load %arg5[%c0_49, %c0_50, %c0_51] : memref<2x8x32xf32, #tpu.memory_space<vmem>>, vector<2x8x32xf32>
    tpu.vector_store %arg5[%c0_49, %c0_50, %c0_51], %180 {strides = array<i32>} : memref<2x8x32xf32, #tpu.memory_space<vmem>>, vector<2x8x32xf32>,
    return
  }
  func.func @transform_0(%arg0: i32) -> (i32, i32, i32) {
    %c0_i32 = arith.constant 0 : i32
    %c0_i32_0 = arith.constant 0 : i32
    %c0_i32_1 = arith.constant 0 : i32
    return %arg0, %c0_i32, %c0_i32_0 : i32, i32, i32
  }
  func.func @transform_1(%arg0: i32) -> (i32, i32) {
    %c0_i32 = arith.constant 0 : i32
    %c0_i32_0 = arith.constant 0 : i32
    %c0_i32_1 = arith.constant 0 : i32
    return %c0_i32, %c0_i32_0 : i32, i32
  }
  func.func @transform_2(%arg0: i32) -> (i32, i32) {
    %c0_i32 = arith.constant 0 : i32
    %c0_i32_0 = arith.constant 0 : i32
    %c0_i32_1 = arith.constant 0 : i32
    return %c0_i32, %c0_i32_0 : i32, i32
  }
  func.func @transform_3(%arg0: i32) -> (i32, i32) {
    %c0_i32 = arith.constant 0 : i32
    %c0_i32_0 = arith.constant 0 : i32
    %c0_i32_1 = arith.constant 0 : i32
    return %c0_i32, %c0_i32_0 : i32, i32
  }
  func.func @transform_4(%arg0: i32) -> (i32, i32, i32) {
    %c0_i32 = arith.constant 0 : i32
    %c0_i32_0 = arith.constant 0 : i32
    %c0_i32_1 = arith.constant 0 : i32
    return %arg0, %c0_i32, %c0_i32_0 : i32, i32, i32
  }
}

</mosaic_0001>

<bundles_post_ra>
// kernel: tpu_custom_call.1
= control target key start
LH: loop header
LB: loop body
LE: loop exit
PB: predicated region body
PF: predicated region fallthrough
CT: control target
= control target key end

     0   :  { %s2122_s0 = inlined_call_operand.vmem [shape: f32[2,8,32], index: 0, kind: input, shape index: {}]   ;;  %s2123_s1 = inlined_call_operand.vmem [shape: bf16[32,768], index: 1, kind: input, shape index: {}]   ;;  %s2124_s2 = inlined_call_operand.vmem [shape: bf16[256,32], index: 2, kind: input, shape index: {}]   ;;  %s2125_s3 = inlined_call_operand.vmem [shape: f32[1,32], index: 3, kind: input, shape index: {}]   ;;  %s2126_s4 = inlined_call_operand.hbm [shape: f32[2,8,32], index: 4, kind: output, shape index: {}]  }
   0x1   :  { %v1448_v0 = vld [vmem:[%s2123_s1 + $0x38] sm:$0xf]  ;;  %v1582_v1 = vld [vmem:[%s2123_s1 + $0x4c] sm:$0xf0]  ;;  %v1579_v2 = vld [vmem:[%s2123_s1 + $0x3c] sm:$0xf] }
   0x2   :  { %v1449_v3 = vor.u32 %v1582_v1, %v1448_v0  ;;  %v1450_v4 = vld [vmem:[%s2123_s1 + $0x50] sm:$0xf0]  ;;  %v1424_v5 = vld [vmem:[%s2123_s1 + $0x8] sm:$0xf]  ;;  %v1576_v6 = vld [vmem:[%s2123_s1 + $0x1c] sm:$0xf0] }
   0x3   :  { %v1453_v7 = vor.u32 %v1579_v2, %v1450_v4  ;;  %v1573_v8 = vld [vmem:[%s2123_s1 + $0xc] sm:$0xf]  ;;  %v1426_v9 = vld [vmem:[%s2123_s1 + $0x20] sm:$0xf0]  ;;  %v1440_v10 = vld [vmem:[%s2123_s1 + $0x30] sm:$0xf]  ;;  %v1425_v11 = vor.u32 %v1576_v6, %v1424_v5 }
   0x4   :  { %132 = vmatpush.bf16.msra.mxu2 %v1449_v3  ;;  %v1581_v12 = vld [vmem:[%s2123_s1 + $0x44] sm:$0xf0]  ;;  %v1578_v13 = vld [vmem:[%s2123_s1 + $0x34] sm:$0xf]  ;;  %v1442_v14 = vld [vmem:[%s2123_s1 + $0x48] sm:$0xf0]  ;;  %v1429_v15 = vor.u32 %v1573_v8, %v1426_v9 }
   0x5   :  { %146 = vmatpush.bf16.msra.mxu3 %v1453_v7  ;;  %v1441_v16 = vor.u32 %v1581_v12, %v1440_v10  ;;  %v1445_v17 = vor.u32 %v1578_v13, %v1442_v14  ;;  %v19_v18 = vld [vmem:[%s2122_s0] sm:$0xff]  ;;  %v20_v19 = vld [vmem:[%s2122_s0 + $0x8] sm:$0xff]  ;;  %v1575_v21 = vld [vmem:[%s2123_s1 + $0x14] sm:$0xf0] }
   0x6   :  { %v1416_v20 = vld [vmem:[%s2123_s1] sm:$0xf]  ;;  %v1572_v22 = vld [vmem:[%s2123_s1 + $0x4] sm:$0xf]  ;;  %v1418_v23 = vld [vmem:[%s2123_s1 + $0x18] sm:$0xf0]  ;;  %v1782_v24 = vpack.c.bf16 %v20_v19, %v19_v18 }
   0x7   :  { %104 = vmatpush.bf16.msra.mxu0 %v1441_v16  ;;  %118 = vmatpush.bf16.msra.mxu1 %v1445_v17  ;;  %v1417_v25 = vor.u32 %v1575_v21, %v1416_v20 }
   0x8   :  { %9 = vsyncpa [#allocation3], 0  ;;  %133 = vmatpush.bf16.msra.mxu2 %v1425_v11  ;;  %vm94_vm0 = vcmask 261120   ;;  %v1421_v26 = vor.u32 %v1572_v22, %v1418_v23  ;;  %s1697_s0 = smov 96   ;;  %v1456_v49 = vld [vmem:[%s2123_s1 + $0x40] sm:$0xf] }
   0x9   :  { %147 = vmatpush.bf16.msra.mxu3 %v1429_v15  ;;  %v1583_v50 = vld [vmem:[%s2123_s1 + $0x54] sm:$0xf0]  ;;  %v1580_v51 = vld [vmem:[%s2123_s1 + $0x44] sm:$0xf]  ;;  %v1458_v53 = vld [vmem:[%s2123_s1 + $0x58] sm:$0xf0] }
   0xa   :  { %v1457_v52 = vor.u32 %v1583_v50, %v1456_v49  ;;  %v1461_v54 = vor.u32 %v1580_v51, %v1458_v53  ;;  %v1432_v55 = vld [vmem:[%s2123_s1 + $0x10] sm:$0xf]  ;;  %v1577_v56 = vld [vmem:[%s2123_s1 + $0x24] sm:$0xf0]  ;;  %v1574_v57 = vld [vmem:[%s2123_s1 + $0x14] sm:$0xf] }
   0xb   :  { %1464 = vmatmul.msk.bf16.vlgmr.msra.gmra.mxu2 %vm94_vm0, %v1782_v24  ;;  %105 = vmatpush.bf16.msra.mxu0 %v1417_v25  ;;  %v1433_v58 = vor.u32 %v1577_v56, %v1432_v55  ;;  %v1434_v59 = vld [vmem:[%s2123_s1 + $0x28] sm:$0xf0]  ;;  %vm259_vm1 = vcmask 64512   ;;  %s1698_s1 = smov 64   ;;  %vm287_vm2 = vcmask 1043456   ;;  %s1699_s15 = smov 32  }
   0xc   :  { %1465 = vmatmul.msk.bf16.vlgmr.msra.gmra.mxu3 %vm94_vm0, %v1782_v24  ;;  %119 = vmatpush.bf16.msra.mxu1 %v1421_v26  ;;  %v1437_v60 = vor.u32 %v1574_v57, %v1434_v59  ;;  %v1587_v55 = vld [vmem:[%s2124_s2 + $0x18] sm:$0xff]  ;;  %v1586_v56 = vld [vmem:[%s2124_s2 + $0x10] sm:$0xff]  ;;  %s1700_s22 = smov [#allocation2]   ;;  %s1402_s25 = sshll.u32 %s2126_s4, 4  ;;  %s1403_s25 = int_to_ptr.hbm [resolvable:$true] %s1402_s25 }
   0xd   :  { %s1400_s23 = sshll.u32 %s1700_s22, 4  ;;  %s1701_s26 = smov 128   ;;  %s1401_s23 = int_to_ptr.vmem [resolvable:$true] %s1400_s23 }
   0xe   :  { %1462 = vmatmul.msk.bf16.vlgmr.msra.gmra.mxu0 %vm94_vm0, %v1782_v24 }
   0xf   :  { %1463 = vmatmul.msk.bf16.vlgmr.msra.gmra.mxu1 %vm94_vm0, %v1782_v24  ;;  %160 = vmatpush.bf16.msrb.mxu0 %v1457_v52 }
  0x10   :  { %174 = vmatpush.bf16.msrb.mxu1 %v1461_v54 }
  0x13   :  { %161 = vmatpush.bf16.msrb.mxu0 %v1433_v58 }
  0x14   :  { %175 = vmatpush.bf16.msrb.mxu1 %v1437_v60 }
  0x1e   :  { %1466 = vmatmul.msk.bf16.vlgmr.msrb.gmra.mxu0 %vm94_vm0, %v1782_v24 }
  0x1f   :  { %1467 = vmatmul.msk.bf16.vlgmr.msrb.gmra.mxu1 %vm94_vm0, %v1782_v24 }
  0x8b   :  { %v107_v27 = vpop.f32.mrf.mxu0 }
  0x8c   :  { %v121_v29 = vpop.f32.mrf.mxu1 }
  0x8d   :  { %v1794_v32 = vpack.c.bf16 %v121_v29, %v107_v27 }
  0x8e   :  { %v135_v28 = vpop.f32.mrf.mxu2 }
  0x8f   :  { %v149_v30 = vpop.f32.mrf.mxu3  ;;  %v325_v37 = vunpack.c.l.b16 %v1794_v32 }
  0x90   :  { %v1792_v31 = vpack.c.bf16 %v149_v30, %v135_v28 }
  0x91   :  { %v1811_v44 = vpack.c.b16 %v325_v37, %v325_v37 }
  0x92   :  { %v225_v33 = vsel %vm94_vm0, %v1792_v31, 0  ;;  %v330_v34 = vunpack.c.l.b16 %v1792_v31 }
  0x93   :  { %234 = vmatpush.bf16.xpose.msrb.mxu2 %v225_v33  ;;  %v109_v40 = vpop.f32.mrf.mxu0 }
  0x94   :  { %v1799_v35 = vpack.c.b16 %v330_v34, %v330_v34  ;;  %v123_v41 = vpop.f32.mrf.mxu1 }
  0x95   :  { %v1813_v45 = vpack.c.bf16 %v123_v41, %v109_v40 }
  0x96   :  { %332 = vrot.lane.b32.xlu0 %v1799_v35, %s1697_s0  ;;  %v137_v36 = vpop.f32.mrf.mxu2 }
  0x97   :  { %v151_v38 = vpop.f32.mrf.mxu3  ;;  %v354_v47 = vunpack.c.l.b16 %v1813_v45 }
  0x98   :  { %v1804_v39 = vpack.c.bf16 %v151_v38, %v137_v36 }
  0x99   :  { %v1824_v48 = vpack.c.b16 %v354_v47, %v354_v47 }
  0x9a   :  { %1468 = vmatmul.msk.bf16.vlgmr.msrb.gmra.mxu2 %vm94_vm0, %v1794_v32  ;;  %v244_v42 = vsel %vm94_vm0, %v1804_v39, 0  ;;  %v359_v43 = vunpack.c.l.b16 %v1804_v39 }
  0x9b   :  { %253 = vmatpush.bf16.xpose.msrb.mxu3 %v244_v42  ;;  %v163_v18 = vpop.f32.mrf.mxu0 }
  0x9c   :  { %v1815_v46 = vpack.c.b16 %v359_v43, %v359_v43  ;;  %v177_v17 = vpop.f32.mrf.mxu1 }
  0x9d   :  { %v1865_v19 = vpack.c.bf16 %v177_v17, %v163_v18 }
  0x9e   :  { %361 = vrot.lane.b32.xlu1 %v1815_v46, %s1697_s0  ;;  %327 = vrot.lane.b32.xlu0 %v1811_v44, %s1697_s0 }
  0x9f   :  { %v407_v22 = vunpack.c.l.b16 %v1865_v19  ;;  %v289_v27 = vsel %vm287_vm2, %v1865_v19, 0 }
  0xa0   :  { %298 = vmatpush.bf16.msra.mxu0 %v289_v27  ;;  %v1585_v27 = vld [vmem:[%s2124_s2 + $0x8] sm:$0xff] }
  0xa1   :  { %v1869_v23 = vpack.c.b16 %v407_v22, %v407_v22  ;;  %v1591_v22 = vld [vmem:[%s2124_s2 + $0x38] sm:$0xff] }
  0xa2   :  { %1469 = vmatmul.msk.bf16.vlgmr.msrb.gmra.mxu3 %vm94_vm0, %v1813_v45 }
  0xa3   :  { %v165_v24 = vpop.f32.mrf.mxu0 }
  0xa4   :  { %v179_v25 = vpop.f32.mrf.mxu1 }
  0xa5   :  { %v1877_v26 = vpack.c.bf16 %v179_v25, %v165_v24  ;;  %v1590_v25 = vld [vmem:[%s2124_s2 + $0x30] sm:$0xff] }
  0xa6   :  { %356 = vrot.lane.b32.xlu1 %v1824_v48, %s1697_s0 }
  0xa7   :  { %v308_v28 = vsel %vm287_vm2, %v1877_v26, 0 }
  0xa8   :  { %317 = vmatpush.bf16.msra.mxu1 %v308_v28 }
 0x108   :  { %v333_v61 = vpop.permute.xlu0 %332 }
 0x109   :  { %v338_v62 = vsel %vm94_vm0, %v333_v61, 0 }
 0x10a   :  { %347 = vmatpush.bf16.xpose.msra.mxu2 %v338_v62 }
 0x110   :  { %v362_v63 = vpop.permute.xlu1 %361  ;;  %v328_v0 = vpop.permute.xlu0 %327 }
 0x111   :  { %v367_v1 = vsel %vm94_vm0, %v362_v63, 0  ;;  %1472 = vmatmul.msk.bf16.vlgmr.msra.gmra.mxu2 %vm94_vm0, %v328_v0  ;;  %v431_v0 = vunpack.c.l.b16 %v1877_v26 }
 0x112   :  { %376 = vmatpush.bf16.xpose.msra.mxu3 %v367_v1  ;;  %476 = vmatpush.bf16.msrb.mxu2 %v1587_v55 }
 0x113   :  { %v1912_v1 = vpack.c.b16 %v431_v0, %v431_v0 }
 0x116   :  { %477 = vmatpush.bf16.msrb.mxu2 %v1586_v56 }
 0x118   :  { %v357_v2 = vpop.permute.xlu1 %356 }
 0x119   :  { %1473 = vmatmul.msk.bf16.vlgmr.msra.gmra.mxu3 %vm94_vm0, %v357_v2 }
 0x11a   :  { %505 = vmatpush.bf16.msrb.mxu3 %v1585_v27 }
 0x11d   :  { %v236_v3 = vpop.f32.mrf.mxu2 }
 0x11e   :  { %v260_v4 = vsel %vm259_vm1, %v236_v3, -inf }
 0x11f   :  { %261 = vmax.xlane.f32.xlu2 %v260_v4 }
 0x125   :  { %v238_v5 = vpop.f32.mrf.mxu2  ;;  %v1861_v6 = vpop.f32.mrf.mxu3 }
 0x126   :  { %v263_v29 = vsel %vm259_vm1, %v1861_v6, -inf }
 0x12d   :  { %v257_v7 = vpop.f32.mrf.mxu3 }
 0x192   :  { %v262_v8 = vpop.xlane.xlu2 %261 }
 0x193   :  { %v266_v9 = vsub.f32 %v236_v3, %v262_v8 }
 0x194   :  { %v349_v10 = vpop.f32.mrf.mxu2 }
 0x195   :  { %v268_v11 = vmul.f32 1.442695, %v266_v9  ;;  %v382_v12 = vsel %vm259_vm1, %v349_v10, -inf }
 0x196   :  { %383 = vmax.xlane.f32.xlu2 %v382_v12 }
 0x197   :  { %1607 = vpow2.f32 %v268_v11 }
 0x19c   :  { %v351_v13 = vpop.f32.mrf.mxu2  ;;  %v378_v14 = vpop.f32.mrf.mxu3 }
 0x19d   :  { %v1608_v15 = vpop.eup %1607  ;;  %v385_v21 = vsel %vm259_vm1, %v378_v14, -inf }
 0x19e   :  { %v272_v16 = vsel %vm259_vm1, %v1608_v15, 0.0 }
 0x19f   :  { %273 = vadd.xlane.f32.xlu0 %v272_v16 }
 0x1a4   :  { %v380_v20 = vpop.f32.mrf.mxu3 }
 0x1a7   :  { %386 = vmax.xlane.f32.xlu0 %v385_v21 }
 0x1ae   :  { %409 = vrot.lane.b32.xlu2 %v1869_v23, %s1697_s0 }
 0x1b6   :  { %515 = vrot.lane.b32.xlu2 %v1799_v35, %s1698_s1 }
 0x1be   :  { %513 = vrot.lane.b32.xlu2 %v1811_v44, %s1698_s1 }
 0x1e7   :  { %264 = vmax.xlane.f32.xlu2 %v263_v29  ;;  %v887_v29 = vrot.slane %v1877_v26, 4 }
 0x1ff   :  { %657 = vrot.lane.b32.xlu2 %v1811_v44, %s1699_s15 }
 0x207   :  { %583 = vrot.lane.b32.xlu2 %v1869_v23, %s1698_s1 }
 0x209   :  { %v384_v30 = vpop.xlane.xlu2 %383 }
 0x20a   :  { %v388_v33 = vsub.f32 %v349_v10, %v384_v30  ;;  %v892_v30 = vsel %vm287_vm2, %v887_v29, 0 }
 0x20c   :  { %v390_v34 = vmul.f32 1.442695, %v388_v33 }
 0x20e   :  { %1609 = vpow2.f32 %v390_v34 }
 0x20f   :  { %682 = vrot.lane.b32.xlu2 %v1815_v46, %s1699_s15 }
 0x211   :  { %v410_v36 = vpop.permute.xlu2 %409 }
 0x212   :  { %v415_v37 = vsel %vm287_vm2, %v410_v36, 0  ;;  %v274_v38 = vpop.xlane.xlu0 %273 }
 0x213   :  { %1611 = vrcp.f32 %v274_v38  ;;  %424 = vmatpush.bf16.msrb.mxu0 %v415_v37  ;;  %v1584_v38 = vld [vmem:[%s2124_s2] sm:$0xff] }
 0x214   :  { %v1610_v40 = vpop.eup %1609  ;;  %506 = vmatpush.bf16.msrb.mxu3 %v1584_v38 }
 0x215   :  { %v394_v41 = vsel %vm259_vm1, %v1610_v40, 0.0 }
 0x216   :  { %395 = vadd.xlane.f32.xlu1 %v394_v41 }
 0x217   :  { %680 = vrot.lane.b32.xlu2 %v1824_v48, %s1699_s15 }
 0x219   :  { %v1612_v42 = vpop.eup %1611  ;;  %v516_v47 = vpop.permute.xlu2 %515 }
 0x21a   :  { %v280_v43 = vmul.f32 %v1612_v42, %v1608_v15  ;;  %v387_v44 = vpop.xlane.xlu0 %386  ;;  %v521_v52 = vsel %vm94_vm0, %v516_v47, 0 }
 0x21b   :  { %v389_v49 = vsub.f32 %v378_v14, %v387_v44 }
 0x21c   :  { %v282_v50 = vpack.c.bf16 %v280_v43, %v280_v43 }
 0x21d   :  { %v392_v51 = vmul.f32 1.442695, %v389_v49 }
 0x21e   :  { %1470 = vmatmul.msk.bf16.vlgmr.msra.gmra.mxu0 %vm259_vm1, %v282_v50 }
 0x21f   :  { %1613 = vpow2.f32 %v392_v51  ;;  %530 = vmatpush.bf16.xpose.msra.mxu0 %v521_v52 }
 0x221   :  { %v514_v57 = vpop.permute.xlu2 %513 }
 0x225   :  { %v1614_v53 = vpop.eup %1613 }
 0x226   :  { %v397_v54 = vsel %vm259_vm1, %v1614_v53, 0.0 }
 0x227   :  { %398 = vadd.xlane.f32.xlu0 %v397_v54 }
 0x23b   :  { %538 = vrot.lane.b32.xlu0 %v1815_v46, %s1698_s1 }
 0x243   :  { %659 = vrot.lane.b32.xlu0 %v1799_v35, %s1699_s15 }
 0x25a   :  { %v265_v58 = vpop.xlane.xlu2 %264 }
 0x25b   :  { %v267_v59 = vsub.f32 %v1861_v6, %v265_v58 }
 0x25d   :  { %v270_v60 = vmul.f32 1.442695, %v267_v59 }
 0x25f   :  { %1615 = vpow2.f32 %v270_v60 }
 0x262   :  { %v658_v46 = vpop.permute.xlu2 %657 }
 0x265   :  { %v1616_v61 = vpop.eup %1615 }
 0x266   :  { %v275_v62 = vsel %vm259_vm1, %v1616_v61, 0.0 }
 0x267   :  { %276 = vadd.xlane.f32.xlu1 %v275_v62 }
 0x26a   :  { %v584_v63 = vpop.permute.xlu2 %583 }
 0x26b   :  { %v589_v35 = vsel %vm287_vm2, %v584_v63, 0 }
 0x26c   :  { %598 = vmatpush.bf16.msra.mxu2 %v589_v35 }
 0x272   :  { %v683_v43 = vpop.permute.xlu2 %682 }
 0x273   :  { %v688_v49 = vsel %vm94_vm0, %v683_v43, 0 }
 0x280   :  { %433 = vrot.lane.b32.xlu1 %v1912_v1, %s1697_s0 }
 0x288   :  { %536 = vrot.lane.b32.xlu1 %v1824_v48, %s1698_s1 }
 0x289   :  { %v396_v2 = vpop.xlane.xlu1 %395 }
 0x28a   :  { %1617 = vrcp.f32 %v396_v2 }
 0x290   :  { %v1618_v3 = vpop.eup %1617 }
 0x291   :  { %v402_v4 = vmul.f32 %v1618_v3, %v1610_v40 }
 0x293   :  { %v404_v5 = vpack.c.bf16 %v402_v4, %v402_v4 }
 0x295   :  { %1474 = vmatmul.msk.bf16.vlgmr.msrb.gmra.mxu0 %vm259_vm1, %v404_v5 }
 0x29a   :  { %v399_v10 = vpop.xlane.xlu0 %398 }
 0x29b   :  { %v300_v6 = vpop.f32.mrf.mxu0 }
 0x2a3   :  { %v302_v7 = vpop.f32.mrf.mxu0 }
 0x2a5   :  { %1494 = vmatmul.msk.bf16.vlgmr.msra.gmra.mxu0 %vm94_vm0, %v514_v57 }
 0x2ad   :  { %v539_v48 = vpop.permute.xlu0 %538 }
 0x2ae   :  { %v544_v17 = vsel %vm94_vm0, %v539_v48, 0 }
 0x2b5   :  { %v660_v18 = vpop.permute.xlu0 %659 }
 0x2b6   :  { %v665_v21 = vsel %vm94_vm0, %v660_v18, 0  ;;  %v801_v18 = vrot.slane %v1794_v32, 4 }
 0x2da   :  { %v277_v8 = vpop.xlane.xlu1 %276 }
 0x2db   :  { %1619 = vrcp.f32 %v277_v8 }
 0x2dc   :  { %1621 = vrcp.f32 %v399_v10 }
 0x2e1   :  { %v1620_v9 = vpop.eup %1619 }
 0x2e2   :  { %v281_v11 = vmul.f32 %v1620_v9, %v1616_v61  ;;  %v1622_v13 = vpop.eup %1621 }
 0x2e3   :  { %v403_v14 = vmul.f32 %v1622_v13, %v1614_v53 }
 0x2e4   :  { %v283_v12 = vpack.c.bf16 %v281_v11, %v281_v11  ;;  %v802_v11 = vrot.slane %v1792_v31, 4 }
 0x2e5   :  { %v405_v20 = vpack.c.bf16 %v403_v14, %v403_v14 }
 0x2e6   :  { %1471 = vmatmul.msk.bf16.vlgmr.msra.gmra.mxu1 %vm259_vm1, %v283_v12  ;;  %v807_v14 = vsel %vm94_vm0, %v802_v11, 0 }
 0x2f2   :  { %v434_v15 = vpop.permute.xlu1 %433 }
 0x2f3   :  { %v439_v16 = vsel %vm287_vm2, %v434_v15, 0 }
 0x2f4   :  { %448 = vmatpush.bf16.msrb.mxu1 %v439_v16 }
 0x2f7   :  { %1475 = vmatmul.msk.bf16.vlgmr.msrb.gmra.mxu1 %vm259_vm1, %v405_v20 }
 0x2f8   :  { %553 = vmatpush.bf16.xpose.msra.mxu1 %v544_v17  ;;  %v681_v17 = vpop.permute.xlu2 %680 }
 0x2fa   :  { %v537_v24 = vpop.permute.xlu1 %536 }
 0x300   :  { %674 = vmatpush.bf16.xpose.msrb.mxu1 %v665_v21 }
 0x307   :  { %1495 = vmatmul.msk.bf16.vlgmr.msra.gmra.mxu1 %vm94_vm0, %v537_v24 }
 0x308   :  { %791 = vmatpush.bf16.msra.mxu1 %v1591_v22 }
 0x30c   :  { %792 = vmatpush.bf16.msra.mxu1 %v1590_v25 }
 0x312   :  { %v426_v28 = vpop.f32.mrf.mxu0 }
 0x317   :  { %1507 = vmatmul.msk.bf16.vlgmr.msrb.gmra.mxu1 %vm94_vm0, %v658_v46 }
 0x318   :  { %901 = vmatpush.bf16.msrb.mxu1 %v892_v30  ;;  %v823_v30 = vrot.slane %v1804_v39, 4 }
 0x31a   :  { %v428_v33 = vpop.f32.mrf.mxu0 }
 0x322   :  { %v532_v34 = vpop.f32.mrf.mxu0 }
 0x323   :  { %v559_v36 = vsel %vm259_vm1, %v532_v34, -inf }
 0x324   :  { %560 = vmax.xlane.f32.xlu1 %v559_v36 }
 0x32a   :  { %v534_v37 = vpop.f32.mrf.mxu0 }
 0x32b   :  { %v828_v37 = vsel %vm94_vm0, %v823_v30, 0 }
 0x363   :  { %v319_v40 = vpop.f32.mrf.mxu1 }
 0x364   :  { %v323_v41 = vpack.c.bf16 %v319_v40, %v300_v6 }
 0x366   :  { %1493 = vmatmul.msk.bf16.vlgmr.msrb.gmra.mxu3 %vm94_vm0, %v323_v41 }
 0x36b   :  { %v321_v42 = vpop.f32.mrf.mxu1 }
 0x36c   :  { %v1589_v42 = vld [vmem:[%s2124_s2 + $0x28] sm:$0xff] }
 0x36d   :  { %647 = vmatpush.bf16.msrb.mxu0 %v1589_v42 }
 0x374   :  { %v450_v44 = vpop.f32.mrf.mxu1 }
 0x375   :  { %v454_v47 = vpack.c.bf16 %v450_v44, %v426_v28 }
 0x377   :  { %1484 = vmatmul.msk.bf16.vlgmr.msrb.gmra.mxu2 %vm94_vm0, %v454_v47 }
 0x378   :  { %697 = vmatpush.bf16.xpose.msrb.mxu2 %v688_v49 }
 0x37c   :  { %v452_v50 = vpop.f32.mrf.mxu1 }
 0x37d   :  { %v822_v50 = vrot.slane %v1813_v45, 4 }
 0x384   :  { %v555_v51 = vpop.f32.mrf.mxu1 }
 0x385   :  { %v562_v52 = vsel %vm259_vm1, %v555_v51, -inf }
 0x386   :  { %563 = vmax.xlane.f32.xlu1 %v562_v52 }
 0x38c   :  { %v557_v53 = vpop.f32.mrf.mxu1 }
 0x394   :  { %v676_v54 = vpop.f32.mrf.mxu1 }
 0x395   :  { %v703_v46 = vsel %vm259_vm1, %v676_v54, -inf }
 0x397   :  { %v561_v55 = vpop.xlane.xlu1 %560 }
 0x398   :  { %v565_v56 = vsub.f32 %v532_v34, %v561_v55 }
 0x39a   :  { %v567_v57 = vmul.f32 1.442695, %v565_v56  ;;  %v1588_v56 = vld [vmem:[%s2124_s2 + $0x20] sm:$0xff] }
 0x39b   :  { %648 = vmatpush.bf16.msrb.mxu0 %v1588_v56 }
 0x39c   :  { %1623 = vpow2.f32 %v567_v57  ;;  %v678_v58 = vpop.f32.mrf.mxu1 }
 0x39f   :  { %604 = vrot.lane.b32.xlu1 %v1912_v1, %s1698_s1 }
 0x3a2   :  { %v1624_v59 = vpop.eup %1623 }
 0x3a3   :  { %v571_v60 = vsel %vm259_vm1, %v1624_v59, 0.0 }
 0x3a4   :  { %572 = vadd.xlane.f32.xlu0 %v571_v60 }
 0x3ac   :  { %704 = vmax.xlane.f32.xlu0 %v703_v46 }
 0x3e9   :  { %v508_v62 = vpop.f32.mrf.mxu3 }
 0x3f1   :  { %v1990_v57 = vpop.f32.mrf.mxu3 }
 0x3f9   :  { %v564_v61 = vpop.xlane.xlu1 %563 }
 0x3fa   :  { %v566_v63 = vsub.f32 %v555_v51, %v564_v61  ;;  %v479_v35 = vpop.f32.mrf.mxu2 }
 0x3fb   :  { %v1950_v0 = vadd.f32 %v508_v62, %v479_v35 }
 0x3fc   :  { %v569_v2 = vmul.f32 1.442695, %v566_v63 }
 0x3fe   :  { %1625 = vpow2.f32 %v569_v2 }
 0x402   :  { %v1968_v25 = vpop.f32.mrf.mxu2 }
 0x404   :  { %v1626_v3 = vpop.eup %1625 }
 0x405   :  { %v574_v4 = vsel %vm259_vm1, %v1626_v3, 0.0 }
 0x406   :  { %575 = vadd.xlane.f32.xlu2 %v574_v4 }
 0x411   :  { %v605_v5 = vpop.permute.xlu1 %604 }
 0x412   :  { %v610_v6 = vsel %vm287_vm2, %v605_v5, 0  ;;  %v867_v5 = vrot.slane %v1865_v19, 4 }
 0x413   :  { %619 = vmatpush.bf16.msra.mxu3 %v610_v6 }
 0x417   :  { %v573_v7 = vpop.xlane.xlu0 %572 }
 0x418   :  { %1627 = vrcp.f32 %v573_v7 }
 0x41e   :  { %v1628_v8 = vpop.eup %1627  ;;  %939 = vrot.lane.b32.xlu2 %v1794_v32, %s1697_s0 }
 0x41f   :  { %v579_v9 = vmul.f32 %v1628_v8, %v1624_v59  ;;  %v705_v10 = vpop.xlane.xlu0 %704 }
 0x420   :  { %v709_v12 = vsub.f32 %v676_v54, %v705_v10 }
 0x421   :  { %v581_v48 = vpack.c.bf16 %v579_v9, %v579_v9  ;;  %v872_v9 = vsel %vm287_vm2, %v867_v5, 0 }
 0x422   :  { %v711_v13 = vmul.f32 1.442695, %v709_v12 }
 0x423   :  { %1496 = vmatmul.msk.bf16.vlgmr.msra.gmra.mxu2 %vm259_vm1, %v581_v48 }
 0x424   :  { %1629 = vpow2.f32 %v711_v13  ;;  %816 = vmatpush.bf16.xpose.msra.mxu2 %v807_v14 }
 0x42a   :  { %v1630_v15 = vpop.eup %1629 }
 0x42b   :  { %v715_v16 = vsel %vm259_vm1, %v1630_v15, 0.0 }
 0x42c   :  { %716 = vadd.xlane.f32.xlu0 %v715_v16 }
 0x433   :  { %1508 = vmatmul.msk.bf16.vlgmr.msrb.gmra.mxu2 %vm94_vm0, %v681_v17 }
 0x440   :  { %727 = vrot.lane.b32.xlu0 %v1869_v23, %s1699_s15 }
 0x443   :  { %1520 = vmatmul.msk.bf16.vlgmr.msra.gmra.mxu2 %vm94_vm0, %v801_v18 }
 0x448   :  { %942 = vrot.lane.b32.xlu0 %v1792_v31, %s1697_s0 }
 0x479   :  { %v576_v20 = vpop.xlane.xlu2 %575 }
 0x47a   :  { %1631 = vrcp.f32 %v576_v20 }
 0x480   :  { %v1632_v21 = vpop.eup %1631 }
 0x481   :  { %v580_v22 = vmul.f32 %v1632_v21, %v1626_v3  ;;  %v940_v54 = vpop.permute.xlu2 %939 }
 0x482   :  { %v941_v55 = vrot.slane %v940_v54, 4 }
 0x483   :  { %v582_v24 = vpack.c.bf16 %v580_v22, %v580_v22 }
 0x485   :  { %1497 = vmatmul.msk.bf16.vlgmr.msra.gmra.mxu3 %vm259_vm1, %v582_v24 }
 0x49f   :  { %v717_v27 = vpop.xlane.xlu0 %716 }
 0x4a0   :  { %1633 = vrcp.f32 %v717_v27 }
 0x4a6   :  { %v600_v28 = vpop.f32.mrf.mxu2  ;;  %v1634_v23 = vpop.eup %1633 }
 0x4a7   :  { %v723_v33 = vmul.f32 %v1634_v23, %v1630_v15 }
 0x4a9   :  { %v725_v38 = vpack.c.bf16 %v723_v33, %v723_v33 }
 0x4ae   :  { %v602_v29 = vpop.f32.mrf.mxu2 }
 0x4b2   :  { %v728_v34 = vpop.permute.xlu0 %727 }
 0x4b3   :  { %v733_v36 = vsel %vm287_vm2, %v728_v34, 0 }
 0x4b4   :  { %742 = vmatpush.bf16.msrb.mxu3 %v733_v36 }
 0x4b6   :  { %v699_v40 = vpop.f32.mrf.mxu2 }
 0x4b7   :  { %1509 = vmatmul.msk.bf16.vlgmr.msrb.gmra.mxu3 %vm259_vm1, %v725_v38  ;;  %v706_v41 = vsel %vm259_vm1, %v699_v40, -inf }
 0x4b8   :  { %837 = vmatpush.bf16.xpose.msra.mxu3 %v828_v37  ;;  %707 = vmax.xlane.f32.xlu1 %v706_v41 }
 0x4ba   :  { %v943_v43 = vpop.permute.xlu0 %942 }
 0x4bb   :  { %v944_v44 = vrot.slane %v943_v43, 4 }
 0x4bd   :  { %v949_v47 = vsel %vm94_vm0, %v944_v44, 0 }
 0x4be   :  { %v701_v49 = vpop.f32.mrf.mxu2 }
 0x4c0   :  { %958 = vmatpush.bf16.xpose.msrb.mxu3 %v949_v47 }
 0x4c6   :  { %v818_v51 = vpop.f32.mrf.mxu2 }
 0x4c7   :  { %1521 = vmatmul.msk.bf16.vlgmr.msra.gmra.mxu3 %vm94_vm0, %v822_v50  ;;  %v843_v52 = vsel %vm259_vm1, %v818_v51, -inf }
 0x4c8   :  { %844 = vmax.xlane.f32.xlu0 %v843_v52 }
 0x4ce   :  { %v820_v53 = vpop.f32.mrf.mxu2 }
 0x4d1   :  { %748 = vrot.lane.b32.xlu1 %v1912_v1, %s1699_s15 }
 0x4d7   :  { %1533 = vmatmul.msk.bf16.vlgmr.msrb.gmra.mxu3 %vm94_vm0, %v941_v55 }
 0x4d9   :  { %964 = vrot.lane.b32.xlu1 %v1813_v45, %s1697_s0 }
 0x508   :  { %v621_v58 = vpop.f32.mrf.mxu3 }
 0x509   :  { %v625_v59 = vpack.c.bf16 %v621_v58, %v600_v28 }
 0x50b   :  { %1506 = vmatmul.msk.bf16.vlgmr.msrb.gmra.mxu0 %vm94_vm0, %v625_v59 }
 0x510   :  { %v623_v60 = vpop.f32.mrf.mxu3 }
 0x52b   :  { %v708_v1 = vpop.xlane.xlu1 %707 }
 0x52c   :  { %v710_v46 = vsub.f32 %v699_v40, %v708_v1 }
 0x52e   :  { %v713_v61 = vmul.f32 1.442695, %v710_v46 }
 0x530   :  { %1635 = vpow2.f32 %v713_v61 }
 0x536   :  { %v1636_v62 = vpop.eup %1635 }
 0x537   :  { %v718_v63 = vsel %vm259_vm1, %v1636_v62, 0.0 }
 0x538   :  { %719 = vadd.xlane.f32.xlu2 %v718_v63 }
 0x53a   :  { %v1994_v35 = vpop.f32.mrf.mxu3 }
 0x53b   :  { %v845_v2 = vpop.xlane.xlu0 %844 }
 0x53c   :  { %v849_v3 = vsub.f32 %v818_v51, %v845_v2 }
 0x53e   :  { %v851_v4 = vmul.f32 1.442695, %v849_v3 }
 0x540   :  { %1637 = vpow2.f32 %v851_v4 }
 0x542   :  { %v746_v6 = vpop.f32.mrf.mxu3 }
 0x543   :  { %v749_v7 = vpop.permute.xlu1 %748 }
 0x544   :  { %v754_v8 = vsel %vm287_vm2, %v749_v7, 0 }
 0x545   :  { %763 = vmatpush.bf16.msra.mxu0 %v754_v8 }
 0x546   :  { %v1638_v10 = vpop.eup %1637 }
 0x547   :  { %v855_v11 = vsel %vm259_vm1, %v1638_v10, 0.0 }
 0x548   :  { %856 = vadd.xlane.f32.xlu0 %v855_v11 }
 0x549   :  { %881 = vmatpush.bf16.msrb.mxu0 %v872_v9 }
 0x54a   :  { %v839_v12 = vpop.f32.mrf.mxu3 }
 0x54b   :  { %v846_v48 = vsel %vm259_vm1, %v839_v12, -inf  ;;  %v965_v27 = vpop.permute.xlu1 %964 }
 0x54c   :  { %847 = vmax.xlane.f32.xlu1 %v846_v48  ;;  %v966_v47 = vrot.slane %v965_v27, 4 }
 0x550   :  { %1092 = vrot.lane.b32.xlu2 %v1792_v31, %s1698_s1 }
 0x552   :  { %v841_v13 = vpop.f32.mrf.mxu3 }
 0x55a   :  { %v960_v14 = vpop.f32.mrf.mxu3 }
 0x55b   :  { %v989_v18 = vsel %vm259_vm1, %v960_v14, -inf }
 0x55c   :  { %967 = vrot.lane.b32.xlu0 %v1804_v39, %s1697_s0 }
 0x562   :  { %v962_v15 = vpop.f32.mrf.mxu3 }
 0x564   :  { %1089 = vrot.lane.b32.xlu0 %v1794_v32, %s1698_s1 }
 0x588   :  { %v650_v16 = vpop.f32.mrf.mxu0 }
 0x589   :  { %v2008_v17 = vadd.f32 %v650_v16, %v1950_v0  ;;  %v1592_v16 = vld [vmem:[%s2124_s2 + $0x40] sm:$0xff] }
 0x58e   :  { %990 = vmax.xlane.f32.xlu0 %v989_v18 }
 0x590   :  { %v2025_v56 = vpop.f32.mrf.mxu0 }
 0x5a2   :  { %1117 = vrot.lane.b32.xlu0 %v1804_v39, %s1698_s1 }
 0x5ab   :  { %v720_v20 = vpop.xlane.xlu2 %719 }
 0x5ac   :  { %1639 = vrcp.f32 %v720_v20 }
 0x5b2   :  { %v1640_v21 = vpop.eup %1639 }
 0x5b3   :  { %v724_v22 = vmul.f32 %v1640_v21, %v1636_v62  ;;  %v1093_v37 = vpop.permute.xlu2 %1092 }
 0x5b4   :  { %v1094_v40 = vrot.slane %v1093_v37, 4 }
 0x5b5   :  { %v726_v24 = vpack.c.bf16 %v724_v22, %v724_v22 }
 0x5b6   :  { %v1099_v44 = vsel %vm94_vm0, %v1094_v40, 0 }
 0x5b7   :  { %1510 = vmatmul.msk.bf16.vlgmr.msra.gmra.mxu0 %vm259_vm1, %v726_v24 }
 0x5bb   :  { %v857_v28 = vpop.xlane.xlu0 %856 }
 0x5bc   :  { %1641 = vrcp.f32 %v857_v28 }
 0x5bf   :  { %v848_v23 = vpop.xlane.xlu1 %847 }
 0x5c0   :  { %v850_v29 = vsub.f32 %v839_v12, %v848_v23 }
 0x5c2   :  { %v1642_v0 = vpop.eup %1641  ;;  %v853_v30 = vmul.f32 1.442695, %v850_v29 }
 0x5c3   :  { %v863_v33 = vmul.f32 %v1642_v0, %v1638_v10 }
 0x5c4   :  { %1643 = vpow2.f32 %v853_v30 }
 0x5c5   :  { %v865_v34 = vpack.c.bf16 %v863_v33, %v863_v33  ;;  %v1595_v33 = vld [vmem:[%s2124_s2 + $0x58] sm:$0xff] }
 0x5c6   :  { %1079 = vmatpush.bf16.msra.mxu3 %v1595_v33 }
 0x5c7   :  { %1522 = vmatmul.msk.bf16.vlgmr.msrb.gmra.mxu0 %vm259_vm1, %v865_v34 }
 0x5ca   :  { %v1644_v36 = vpop.eup %1643 }
 0x5cb   :  { %v858_v38 = vsel %vm259_vm1, %v1644_v36, 0.0 }
 0x5cc   :  { %859 = vadd.xlane.f32.xlu2 %v858_v38  ;;  %v1594_v38 = vld [vmem:[%s2124_s2 + $0x50] sm:$0xff] }
 0x5cd   :  { %1080 = vmatpush.bf16.msra.mxu3 %v1594_v38 }
 0x5ce   :  { %v968_v41 = vpop.permute.xlu0 %967 }
 0x5cf   :  { %v969_v42 = vrot.slane %v968_v41, 4 }
 0x5d1   :  { %v974_v43 = vsel %vm94_vm0, %v969_v42, 0 }
 0x5d2   :  { %983 = vmatpush.bf16.xpose.msra.mxu0 %v974_v43 }
 0x5d6   :  { %v1090_v49 = vpop.permute.xlu0 %1089 }
 0x5d7   :  { %v1091_v50 = vrot.slane %v1090_v49, 4 }
 0x5d9   :  { %1534 = vmatmul.msk.bf16.vlgmr.msra.gmra.mxu0 %vm94_vm0, %v966_v47 }
 0x5da   :  { %1108 = vmatpush.bf16.xpose.msrb.mxu0 %v1099_v44 }
 0x5e4   :  { %1114 = vrot.lane.b32.xlu2 %v1813_v45, %s1698_s1 }
 0x5e9   :  { %1546 = vmatmul.msk.bf16.vlgmr.msrb.gmra.mxu0 %vm94_vm0, %v1091_v50 }
 0x601   :  { %v991_v51 = vpop.xlane.xlu0 %990 }
 0x602   :  { %v995_v52 = vsub.f32 %v960_v14, %v991_v51 }
 0x604   :  { %v997_v53 = vmul.f32 1.442695, %v995_v52 }
 0x606   :  { %1645 = vpow2.f32 %v997_v53 }
 0x60c   :  { %v1646_v54 = vpop.eup %1645 }
 0x60d   :  { %v1001_v55 = vsel %vm259_vm1, %v1646_v54, 0.0 }
 0x60e   :  { %1002 = vadd.xlane.f32.xlu1 %v1001_v55 }
 0x614   :  { %v1118_v9 = vpop.permute.xlu0 %1117 }
 0x615   :  { %v1119_v11 = vrot.slane %v1118_v9, 4 }
 0x627   :  { %1013 = vrot.lane.b32.xlu1 %v1865_v19, %s1697_s0 }
 0x634   :  { %v765_v58 = vpop.f32.mrf.mxu0 }
 0x635   :  { %v769_v59 = vpack.c.bf16 %v765_v58, %v1994_v35 }
 0x637   :  { %1519 = vmatmul.msk.bf16.vlgmr.msra.gmra.mxu1 %vm94_vm0, %v769_v59 }
 0x63c   :  { %v767_v60 = vpop.f32.mrf.mxu0 }
 0x63f   :  { %v860_v1 = vpop.xlane.xlu2 %859 }
 0x640   :  { %1647 = vrcp.f32 %v860_v1 }
 0x644   :  { %v883_v46 = vpop.f32.mrf.mxu0 }
 0x646   :  { %v1648_v61 = vpop.eup %1647 }
 0x647   :  { %v864_v62 = vmul.f32 %v1648_v61, %v1644_v36  ;;  %v1115_v18 = vpop.permute.xlu2 %1114 }
 0x648   :  { %v1116_v20 = vrot.slane %v1115_v18, 4 }
 0x649   :  { %v866_v63 = vpack.c.bf16 %v864_v62, %v864_v62 }
 0x64b   :  { %1523 = vmatmul.msk.bf16.vlgmr.msrb.gmra.mxu1 %vm259_vm1, %v866_v63 }
 0x64c   :  { %v885_v2 = vpop.f32.mrf.mxu0 }
 0x656   :  { %v985_v3 = vpop.f32.mrf.mxu0 }
 0x657   :  { %v992_v4 = vsel %vm259_vm1, %v985_v3, -inf }
 0x658   :  { %993 = vmax.xlane.f32.xlu1 %v992_v4 }
 0x65e   :  { %v987_v5 = vpop.f32.mrf.mxu0 }
 0x666   :  { %v1110_v6 = vpop.f32.mrf.mxu0 }
 0x667   :  { %v1139_v35 = vsel %vm259_vm1, %v1110_v6, -inf }
 0x668   :  { %1140 = vmax.xlane.f32.xlu0 %v1139_v35 }
 0x66e   :  { %v1112_v7 = vpop.f32.mrf.mxu0 }
 0x671   :  { %1035 = vrot.lane.b32.xlu1 %v1877_v26, %s1697_s0 }
 0x679   :  { %1267 = vrot.lane.b32.xlu1 %v1804_v39, %s1699_s15  ;;  %v1124_v39 = vsel %vm94_vm0, %v1119_v11, 0 }
 0x67c   :  { %1163 = vrot.lane.b32.xlu0 %v1865_v19, %s1698_s1 }
 0x681   :  { %1264 = vrot.lane.b32.xlu1 %v1813_v45, %s1699_s15  ;;  %v1003_v8 = vpop.xlane.xlu1 %1002  ;;  %v1593_v45 = vld [vmem:[%s2124_s2 + $0x48] sm:$0xff] }
 0x682   :  { %1649 = vrcp.f32 %v1003_v8  ;;  %929 = vmatpush.bf16.msrb.mxu2 %v1593_v45 }
 0x686   :  { %930 = vmatpush.bf16.msrb.mxu2 %v1592_v16 }
 0x688   :  { %v1650_v10 = vpop.eup %1649 }
 0x689   :  { %1185 = vrot.lane.b32.xlu1 %v1877_v26, %s1698_s1  ;;  %v1009_v48 = vmul.f32 %v1650_v10, %v1646_v54 }
 0x68b   :  { %v1011_v15 = vpack.c.bf16 %v1009_v48, %v1009_v48 }
 0x699   :  { %v1014_v12 = vpop.permute.xlu1 %1013 }
 0x69a   :  { %v1015_v13 = vrot.slane %v1014_v12, 4 }
 0x69c   :  { %v1020_v14 = vsel %vm287_vm2, %v1015_v13, 0 }
 0x69d   :  { %1029 = vmatpush.bf16.msra.mxu1 %v1020_v14 }
 0x6a0   :  { %1535 = vmatmul.msk.bf16.vlgmr.msra.gmra.mxu1 %vm259_vm1, %v1011_v15 }
 0x6a1   :  { %1133 = vmatpush.bf16.xpose.msrb.mxu1 %v1124_v39 }
 0x6b0   :  { %1547 = vmatmul.msk.bf16.vlgmr.msrb.gmra.mxu1 %vm94_vm0, %v1116_v20 }
 0x6b4   :  { %v794_v21 = vpop.f32.mrf.mxu1 }
 0x6b5   :  { %v799_v22 = vadd.f32 %v794_v21, %v2008_v17 }
 0x6bc   :  { %v2053_v24 = vpop.f32.mrf.mxu1 }
 0x6c8   :  { %v903_v27 = vpop.f32.mrf.mxu1 }
 0x6c9   :  { %v907_v28 = vpack.c.bf16 %v903_v27, %v883_v46 }
 0x6cb   :  { %v994_v23 = vpop.xlane.xlu1 %993  ;;  %1532 = vmatmul.msk.bf16.vlgmr.msrb.gmra.mxu2 %vm94_vm0, %v907_v28 }
 0x6cc   :  { %v996_v29 = vsub.f32 %v985_v3, %v994_v23 }
 0x6ce   :  { %v999_v0 = vmul.f32 1.442695, %v996_v29 }
 0x6d0   :  { %1651 = vpow2.f32 %v999_v0  ;;  %v905_v30 = vpop.f32.mrf.mxu1 }
 0x6d6   :  { %v1652_v34 = vpop.eup %1651 }
 0x6d7   :  { %v1004_v36 = vsel %vm259_vm1, %v1652_v34, 0.0 }
 0x6d8   :  { %1005 = vadd.xlane.f32.xlu2 %v1004_v36 }
 0x6db   :  { %v1141_v17 = vpop.xlane.xlu0 %1140 }
 0x6dc   :  { %v1145_v37 = vsub.f32 %v1110_v6, %v1141_v17 }
 0x6de   :  { %v1147_v40 = vmul.f32 1.442695, %v1145_v37 }
 0x6e0   :  { %1653 = vpow2.f32 %v1147_v40  ;;  %v1597_v40 = vld [vmem:[%s2124_s2 + $0x68] sm:$0xff] }
 0x6e1   :  { %1229 = vmatpush.bf16.msra.mxu0 %v1597_v40 }
 0x6e3   :  { %v1036_v41 = vpop.permute.xlu1 %1035 }
 0x6e4   :  { %v1037_v42 = vrot.slane %v1036_v41, 4  ;;  %v1596_v41 = vld [vmem:[%s2124_s2 + $0x60] sm:$0xff] }
 0x6e5   :  { %1230 = vmatpush.bf16.msra.mxu0 %v1596_v41 }
 0x6e6   :  { %v1654_v43 = vpop.eup %1653  ;;  %v1042_v44 = vsel %vm287_vm2, %v1037_v42, 0 }
 0x6e7   :  { %1051 = vmatpush.bf16.msra.mxu2 %v1042_v44  ;;  %v1151_v47 = vsel %vm259_vm1, %v1654_v43, 0.0 }
 0x6e8   :  { %1152 = vadd.xlane.f32.xlu0 %v1151_v47 }
 0x6eb   :  { %v1268_v49 = vpop.permute.xlu1 %1267 }
 0x6ec   :  { %v1269_v3 = vrot.slane %v1268_v49, 4 }
 0x6ee   :  { %v1164_v50 = vpop.permute.xlu0 %1163  ;;  %v1274_v7 = vsel %vm94_vm0, %v1269_v3, 0 }
 0x6ef   :  { %v1165_v51 = vrot.slane %v1164_v50, 4 }
 0x6f0   :  { %1242 = vrot.lane.b32.xlu2 %v1792_v31, %s1699_s15 }
 0x6f1   :  { %v1170_v52 = vsel %vm287_vm2, %v1165_v51, 0 }
 0x6f2   :  { %1179 = vmatpush.bf16.msrb.mxu2 %v1170_v52 }
 0x6f3   :  { %v1265_v53 = vpop.permute.xlu1 %1264 }
 0x6f4   :  { %v1266_v13 = vrot.slane %v1265_v53, 4 }
 0x6fb   :  { %v1186_v54 = vpop.permute.xlu1 %1185 }
 0x6fc   :  { %v1187_v55 = vrot.slane %v1186_v54, 4  ;;  %1239 = vrot.lane.b32.xlu0 %v1794_v32, %s1699_s15 }
 0x6fe   :  { %v1192_v58 = vsel %vm287_vm2, %v1187_v55, 0 }
 0x6ff   :  { %1201 = vmatpush.bf16.msrb.mxu3 %v1192_v58 }
 0x71d   :  { %v1031_v59 = vpop.f32.mrf.mxu1 }
 0x725   :  { %v1033_v60 = vpop.f32.mrf.mxu1 }
 0x72d   :  { %v1135_v1 = vpop.f32.mrf.mxu1 }
 0x72e   :  { %v1142_v46 = vsel %vm259_vm1, %v1135_v1, -inf }
 0x72f   :  { %1143 = vmax.xlane.f32.xlu2 %v1142_v46 }
 0x735   :  { %v1137_v61 = vpop.f32.mrf.mxu1 }
 0x74b   :  { %v1006_v31 = vpop.xlane.xlu2 %1005 }
 0x74c   :  { %1655 = vrcp.f32 %v1006_v31 }
 0x74e   :  { %v932_v62 = vpop.f32.mrf.mxu2 }
 0x74f   :  { %v937_v63 = vadd.f32 %v932_v62, %v799_v22 }
 0x752   :  { %v1656_v2 = vpop.eup %1655 }
 0x753   :  { %v1010_v4 = vmul.f32 %v1656_v2, %v1652_v34  ;;  %v1243_v5 = vpop.permute.xlu2 %1242 }
 0x754   :  { %v1244_v6 = vrot.slane %v1243_v5, 4 }
 0x755   :  { %v1012_v32 = vpack.c.bf16 %v1010_v4, %v1010_v4 }
 0x756   :  { %v1249_v35 = vsel %vm94_vm0, %v1244_v6, 0  ;;  %v2079_v18 = vpop.f32.mrf.mxu2 }
 0x757   :  { %1536 = vmatmul.msk.bf16.vlgmr.msra.gmra.mxu2 %vm259_vm1, %v1012_v32  ;;  %1258 = vmatpush.bf16.xpose.msra.mxu1 %v1249_v35 }
 0x758   :  { %1283 = vmatpush.bf16.xpose.msra.mxu2 %v1274_v7 }
 0x75b   :  { %v1153_v8 = vpop.xlane.xlu0 %1152 }
 0x75c   :  { %1657 = vrcp.f32 %v1153_v8  ;;  %v511_v8 = vadd.f32 %v1990_v57, %v1968_v25  ;;  %v1598_v25 = vld [vmem:[%s2124_s2 + $0x70] sm:$0xff] }
 0x762   :  { %v1658_v9 = vpop.eup %1657 }
 0x763   :  { %v1159_v10 = vmul.f32 %v1658_v9, %v1654_v43 }
 0x765   :  { %v1161_v11 = vpack.c.bf16 %v1159_v10, %v1159_v10  ;;  %v656_v10 = vadd.f32 %v2025_v56, %v511_v8 }
 0x767   :  { %1548 = vmatmul.msk.bf16.vlgmr.msrb.gmra.mxu2 %vm259_vm1, %v1161_v11 }
 0x76e   :  { %v1240_v12 = vpop.permute.xlu0 %1239 }
 0x76f   :  { %v1241_v48 = vrot.slane %v1240_v12, 4  ;;  %v800_v12 = vadd.f32 %v2053_v24, %v656_v10 }
 0x771   :  { %1559 = vmatmul.msk.bf16.vlgmr.msra.gmra.mxu1 %vm94_vm0, %v1241_v48  ;;  %v938_v48 = vadd.f32 %v2079_v18, %v800_v12  ;;  %v1606_v18 = vld [vmem:[%s2125_s3] ss:$0 sm:$0xff]  ;;  %s1702_s3 = smov 8  }
 0x777   :  { %1560 = vmatmul.msk.bf16.vlgmr.msra.gmra.mxu2 %vm94_vm0, %v1266_v13 }
 0x7a2   :  { %v1144_v14 = vpop.xlane.xlu2 %1143 }
 0x7a3   :  { %v1146_v39 = vsub.f32 %v1135_v1, %v1144_v14 }
 0x7a5   :  { %v1149_v45 = vmul.f32 1.442695, %v1146_v39 }
 0x7a7   :  { %1659 = vpow2.f32 %v1149_v45  ;;  %v1599_v45 = vld [vmem:[%s2124_s2 + $0x78] sm:$0xff] }
 0x7a8   :  { %1379 = vmatpush.bf16.msrb.mxu1 %v1599_v45 }
 0x7ac   :  { %1380 = vmatpush.bf16.msrb.mxu1 %v1598_v25 }
 0x7ad   :  { %v1660_v15 = vpop.eup %1659 }
 0x7ae   :  { %v1154_v16 = vsel %vm259_vm1, %v1660_v15, 0.0 }
 0x7af   :  { %1155 = vadd.xlane.f32.xlu0 %v1154_v16 }
 0x7da   :  { %v1053_v20 = vpop.f32.mrf.mxu2 }
 0x7db   :  { %v1057_v21 = vpack.c.bf16 %v1053_v20, %v1031_v59 }
 0x7dd   :  { %1545 = vmatmul.msk.bf16.vlgmr.msra.gmra.mxu3 %vm94_vm0, %v1057_v21 }
 0x7e2   :  { %v1055_v22 = vpop.f32.mrf.mxu2 }
 0x7ea   :  { %v1181_v27 = vpop.f32.mrf.mxu2 }
 0x7ee   :  { %v1260_v28 = vpop.f32.mrf.mxu1 }
 0x7ef   :  { %v1289_v23 = vsel %vm259_vm1, %v1260_v28, -inf }
 0x7f0   :  { %1290 = vmax.xlane.f32.xlu1 %v1289_v23 }
 0x7f2   :  { %v1183_v29 = vpop.f32.mrf.mxu2 }
 0x7f6   :  { %v1262_v0 = vpop.f32.mrf.mxu1 }
 0x7fa   :  { %v1285_v30 = vpop.f32.mrf.mxu2 }
 0x7fb   :  { %v1292_v33 = vsel %vm259_vm1, %v1285_v30, -inf }
 0x7fc   :  { %1293 = vmax.xlane.f32.xlu2 %v1292_v33 }
 0x802   :  { %v1287_v34 = vpop.f32.mrf.mxu2 }
 0x809   :  { %1335 = vrot.lane.b32.xlu1 %v1877_v26, %s1699_s15 }
 0x822   :  { %v1156_v36 = vpop.xlane.xlu0 %1155 }
 0x823   :  { %1661 = vrcp.f32 %v1156_v36 }
 0x829   :  { %v1662_v17 = vpop.eup %1661 }
 0x82a   :  { %v1160_v37 = vmul.f32 %v1662_v17, %v1660_v15 }
 0x82c   :  { %v1162_v38 = vpack.c.bf16 %v1160_v37, %v1160_v37 }
 0x82e   :  { %1549 = vmatmul.msk.bf16.vlgmr.msrb.gmra.mxu3 %vm259_vm1, %v1162_v38 }
 0x860   :  { %v1082_v42 = vpop.f32.mrf.mxu3 }
 0x861   :  { %v1087_v43 = vadd.f32 %v1082_v42, %v937_v63 }
 0x863   :  { %v1291_v26 = vpop.xlane.xlu1 %1290 }
 0x864   :  { %v1295_v44 = vsub.f32 %v1260_v28, %v1291_v26 }
 0x866   :  { %v1297_v47 = vmul.f32 1.442695, %v1295_v44 }
 0x868   :  { %1663 = vpow2.f32 %v1297_v47  ;;  %v1084_v1 = vpop.f32.mrf.mxu3 }
 0x869   :  { %v1088_v13 = vadd.f32 %v1084_v1, %v938_v48 }
 0x86e   :  { %v1664_v49 = vpop.eup %1663 }
 0x86f   :  { %v1294_v50 = vpop.xlane.xlu2 %1293  ;;  %v1301_v51 = vsel %vm259_vm1, %v1664_v49, 0.0 }
 0x870   :  { %v1296_v52 = vsub.f32 %v1285_v30, %v1294_v50  ;;  %1302 = vadd.xlane.f32.xlu0 %v1301_v51 }
 0x872   :  { %v1299_v53 = vmul.f32 1.442695, %v1296_v52 }
 0x874   :  { %1665 = vpow2.f32 %v1299_v53 }
 0x87a   :  { %v1666_v54 = vpop.eup %1665 }
 0x87b   :  { %v1336_v55 = vpop.permute.xlu1 %1335  ;;  %v1304_v58 = vsel %vm259_vm1, %v1666_v54, 0.0 }
 0x87c   :  { %v1337_v59 = vrot.slane %v1336_v55, 4  ;;  %1305 = vadd.xlane.f32.xlu2 %v1304_v58 }
 0x87e   :  { %v1342_v60 = vsel %vm287_vm2, %v1337_v59, 0 }
 0x87f   :  { %1351 = vmatpush.bf16.msrb.mxu0 %v1342_v60 }
 0x884   :  { %1313 = vrot.lane.b32.xlu0 %v1865_v19, %s1699_s15 }
 0x8b1   :  { %v1203_v46 = vpop.f32.mrf.mxu3 }
 0x8b2   :  { %v1207_v61 = vpack.c.bf16 %v1203_v46, %v1181_v27 }
 0x8b4   :  { %1558 = vmatmul.msk.bf16.vlgmr.msra.gmra.mxu0 %vm94_vm0, %v1207_v61 }
 0x8b9   :  { %v1205_v31 = vpop.f32.mrf.mxu3 }
 0x8e3   :  { %v1303_v62 = vpop.xlane.xlu0 %1302 }
 0x8e4   :  { %1667 = vrcp.f32 %v1303_v62 }
 0x8ea   :  { %v1668_v2 = vpop.eup %1667 }
 0x8eb   :  { %v1309_v5 = vmul.f32 %v1668_v2, %v1664_v49 }
 0x8ed   :  { %v1311_v19 = vpack.c.bf16 %v1309_v5, %v1309_v5 }
 0x8ef   :  { %v1306_v63 = vpop.xlane.xlu2 %1305 }
 0x8f0   :  { %1669 = vrcp.f32 %v1306_v63 }
 0x8f6   :  { %v1670_v3 = vpop.eup %1669  ;;  %v1314_v4 = vpop.permute.xlu0 %1313 }
 0x8f7   :  { %v1310_v6 = vmul.f32 %v1670_v3, %v1666_v54  ;;  %v1315_v32 = vrot.slane %v1314_v4, 4 }
 0x8f9   :  { %v1312_v35 = vpack.c.bf16 %v1310_v6, %v1310_v6  ;;  %v1320_v7 = vsel %vm287_vm2, %v1315_v32, 0 }
 0x8fa   :  { %1329 = vmatpush.bf16.msra.mxu3 %v1320_v7 }
 0x8fb   :  { %1562 = vmatmul.msk.bf16.vlgmr.msrb.gmra.mxu0 %vm259_vm1, %v1312_v35 }
 0x8fd   :  { %1561 = vmatmul.msk.bf16.vlgmr.msra.gmra.mxu3 %vm259_vm1, %v1311_v19 }
 0x931   :  { %v1232_v9 = vpop.f32.mrf.mxu0 }
 0x932   :  { %v1237_v11 = vadd.f32 %v1232_v9, %v1087_v43 }
 0x939   :  { %v1234_v14 = vpop.f32.mrf.mxu0 }
 0x93a   :  { %v1238_v39 = vadd.f32 %v1234_v14, %v1088_v13 }
 0x978   :  { %v1353_v57 = vpop.f32.mrf.mxu0 }
 0x980   :  { %v1331_v56 = vpop.f32.mrf.mxu3  ;;  %v1355_v15 = vpop.f32.mrf.mxu0 }
 0x981   :  { %v1357_v16 = vpack.c.bf16 %v1353_v57, %v1331_v56 }
 0x983   :  { %1571 = vmatmul.msk.bf16.vlgmr.msrb.gmra.mxu1 %vm94_vm0, %v1357_v16 }
 0x988   :  { %v1333_v24 = vpop.f32.mrf.mxu3 }
 0xa00   :  { %v1382_v20 = vpop.f32.mrf.mxu1 }
 0xa01   :  { %v1387_v21 = vadd.f32 %v1382_v20, %v1237_v11 }
 0xa03   :  { %v1392_v22 = vadd.f32 %v1606_v18, %v1387_v21 }
 0xa05   :  { %1394 = vst.msk [vmem:[#allocation2] sm:$0xff] %vm94_vm0, %v1392_v22 }
 0xa08   :  { %v1384_v27 = vpop.f32.mrf.mxu1 }
 0xa09   :  { %v1388_v28 = vadd.f32 %v1384_v27, %v1238_v39 }
 0xa0b   :  { %v1393_v23 = vadd.f32 %v1606_v18, %v1388_v28 }
 0xa0d   :  { %1395 = vst.msk [vmem:[#allocation2 + $0x8] sm:$0xff] %vm94_vm0, %v1393_v23 }
 0xa0e   :  { %1408 = dma.vmem_to_hbm [thread:$0]  %s1401_s23, 256, %s1403_s25, [#allocation3], %s1701_s26, %s1701_s26, %s1702_s3  }
 0xa0f   :  { %1695 = dma.done.wait [#allocation3], 256  }
 0xa10   :  { %1696 = vsyncadd [#allocation3], 4294967040 }
 0xa11   :  { %1413 = vsyncpa [#allocation3], 1 }

</bundles_post_ra>
